<compile_context>
chip_gen: v7x
topology: tpu7x:2x2x1
jax: 0.10.0
libtpu: 0.0.40
codegen_flags: <defaults>
</compile_context>

<pallas_src>
import functools
from dataclasses import dataclass

import jax
import jax.numpy as jnp
from jax.experimental import pallas as pl
from jax.experimental.pallas import tpu as pltpu


@dataclass(frozen=True)
class Config:
    item_size: int = 50
    hidden_size: int = 32
    max_seq_length: int = 8
    num_heads: int = 2
    num_layers: int = 2
    intermediate_size: int = 128  # 4 * hidden
    zero_pad: int = 1
    use_causalmask: int = 1
    ablate: int = 0
    switch_order: int = 0


LN_EPS = 1e-12

# Row layout of the packed per-layer vector tensor (L, 9, H).
_BQ, _BK, _BV, _BO, _LN1G, _LN1B, _B2, _LN2G, _LN2B = range(9)


def _gelu_tanh(x):
    # TODO(synk): reference Encoder uses exact erf-GELU; tanh approximation used here.
    return 0.5 * x * (1.0 + jnp.tanh(0.7978845608028654 * (x + 0.044715 * x * x * x)))


def _layernorm(v, g, b):
    # single-pass statistics: var = E[x^2] - E[x]^2
    u = jnp.mean(v, axis=-1, keepdims=True)
    m2 = jnp.mean(v * v, axis=-1, keepdims=True)
    var = jnp.maximum(m2 - u * u, 0.0)
    return (v - u) * jax.lax.rsqrt(var + LN_EPS) * g + b


# ----------------------------------------------------------------------------
# Fused kernel: embedding LayerNorm (+ zero_pad) + all encoder layers.
# TB batch rows per grid step; all weights (stacked over layers) VMEM-resident.
# ----------------------------------------------------------------------------
def fused_forward_kernel(num_heads, num_layers, use_causal, zero_pad,
                         emb_ref, amk_ref, amq_ref, embln_ref,
                         wattn_ref, w1b_ref, w2_ref, vec_ref,
                         out_ref):
    TB, S, H = emb_ref.shape
    M = TB * S
    hd = H // num_heads
    scale = 1.0 / float(hd) ** 0.5

    # ---- additive attention mask, built in-kernel (no (B,S,S) HBM tensor) ----
    amk = amk_ref[...]                                       # (TB, 1, S) valid-key mask
    if use_causal:
        r = jax.lax.broadcasted_iota(jnp.int32, (S, S), 0)
        c = jax.lax.broadcasted_iota(jnp.int32, (S, S), 1)
        keep = amk * (c <= r).astype(jnp.float32)            # (TB, S, S)
    else:
        keep = jnp.broadcast_to(amk, (TB, S, S))
    ext = (1.0 - keep) * -10000.0                            # (TB, S, S)

    # ---- embedding LayerNorm (+ zero_pad masking on query positions) ----
    x3 = _layernorm(emb_ref[...], embln_ref[0:1, :], embln_ref[1:2, :])   # (TB, S, H)
    if zero_pad:
        x3 = x3 * amq_ref[...]                               # (TB, S, 1)
    # flatten rows for the dense matmuls (S == 8 -> relayout-free collapse)
    x = x3.reshape(M, H)

    # ---- encoder layers (static loop; packed weights stay resident) ----
    for l in range(num_layers):
        # fused QKV(+O) projection: one (M,H) x (H,4H) dot; the wo columns of the
        # product are unused filler (same MXU pass width either way).
        qkvo = jnp.dot(x, wattn_ref[l], preferred_element_type=jnp.float32)   # (M, 4H)
        q = (qkvo[:, 0 * H:1 * H] + vec_ref[l, _BQ:_BQ + 1, :]).reshape(TB, S, H)
        k = (qkvo[:, 1 * H:2 * H] + vec_ref[l, _BK:_BK + 1, :]).reshape(TB, S, H)
        v = (qkvo[:, 2 * H:3 * H] + vec_ref[l, _BV:_BV + 1, :]).reshape(TB, S, H)

        # per-head attention; output projection accumulated head-by-head from
        # sublane slices of the packed weight (no ctx scratch / concatenate).
        attn = None
        for h in range(num_heads):                           # static, small head count
            lo = h * hd
            qh = q[:, :, lo:lo + hd]
            kh = k[:, :, lo:lo + hd]
            vh = v[:, :, lo:lo + hd]
            s = jnp.einsum("bqd,bkd->bqk", qh, kh,
                           preferred_element_type=jnp.float32) * scale + ext   # (TB,S,S)
            s = s - jnp.max(s, axis=-1, keepdims=True)
            p = jnp.exp(s)
            p = p * pl.reciprocal(jnp.sum(p, axis=-1, keepdims=True), approx=True)
            ctx = jnp.einsum("bqk,bkd->bqd", p, vh,
                             preferred_element_type=jnp.float32)               # (TB,S,hd)
            contrib = jnp.dot(ctx.reshape(M, hd),
                              wattn_ref[l, lo:lo + hd, 3 * H:4 * H],
                              preferred_element_type=jnp.float32)              # (M, H)
            attn = contrib if attn is None else attn + contrib
        attn = attn + vec_ref[l, _BO:_BO + 1, :]

        h1 = _layernorm(attn + x,
                        vec_ref[l, _LN1G:_LN1G + 1, :],
                        vec_ref[l, _LN1B:_LN1B + 1, :])                        # (M, H)

        inter = _gelu_tanh(
            jnp.dot(h1, w1b_ref[l, 0:H, :], preferred_element_type=jnp.float32)
            + w1b_ref[l, H:H + 1, :])                                          # (M, I)
        ff = (jnp.dot(inter, w2_ref[l], preferred_element_type=jnp.float32)
              + vec_ref[l, _B2:_B2 + 1, :])                                    # (M, H)
        x = _layernorm(ff + h1,
                       vec_ref[l, _LN2G:_LN2G + 1, :],
                       vec_ref[l, _LN2B:_LN2B + 1, :])

    out_ref[...] = x.reshape(TB, S, H)


def _pick_tb(B, S):
    """Rows per grid step: aim for TB*S >= 128 (MXU row fill), keep grid length >= 2
    when B >= 2 (v7x megacore), and require TB to divide B."""
    tb = min(B, max(1, -(-128 // S)))
    if B >= 2:
        tb = min(tb, B // 2)
    tb = max(tb, 1)
    while B % tb:
        tb -= 1
    return tb


def fused_forward_call(emb, am_k, am_q, params, cfg: Config):
    B, S, H = emb.shape
    L = cfg.num_layers
    I = cfg.intermediate_size
    TB = _pick_tb(B, S)
    assert B % TB == 0

    def const(shape):
        nd = len(shape)
        return pl.BlockSpec(shape, lambda i, _nd=nd: (0,) * _nd)

    kernel = functools.partial(
        fused_forward_kernel, cfg.num_heads, L,
        cfg.use_causalmask == 1, cfg.zero_pad == 1)

    return pl.pallas_call(
        kernel,
        out_shape=jax.ShapeDtypeStruct((B, S, H), jnp.float32),
        grid=(B // TB,),
        in_specs=[
            pl.BlockSpec((TB, S, H), lambda i: (i, 0, 0)),   # embeddings (TB rows)
            pl.BlockSpec((TB, 1, S), lambda i: (i, 0, 0)),   # key-valid mask rows
            pl.BlockSpec((TB, S, 1), lambda i: (i, 0, 0)),   # zero_pad mask columns
            const((2, H)),                                   # emb LN gamma/beta
            const((L, H, 4 * H)),                            # wq|wk|wv|wo packed
            const((L, H + 1, I)),                            # w1 with b1 as last row
            const((L, I, H)),                                # w2
            const((L, 9, H)),                                # bq bk bv bo ln1 g/b b2 ln2 g/b
        ],
        out_specs=pl.BlockSpec((TB, S, H), lambda i: (i, 0, 0)),
        compiler_params=pltpu.CompilerParams(dimension_semantics=("parallel",)),
    )(emb, am_k, am_q, params["emb_ln"], params["w_attn"],
      params["w1b"], params["w2"], params["vec"])


# ----------------------------------------------------------------------------
# Full forward (embedding gather = glue; everything else in the fused kernel).
# ----------------------------------------------------------------------------
def our_recommender_forward(params, input_ids, cfg: Config):
    B, S = input_ids.shape

    mask = (input_ids > 0).astype(jnp.float32)                    # (B, S)
    am_k = mask[:, None, :]                                       # (B, 1, S)
    am_q = mask[:, :, None]                                       # (B, S, 1)

    # embedding lookup (gather) is glue
    item_emb = params["item_emb"][input_ids]                      # (B, S, H)
    pos_emb = params["pos_emb"][jnp.arange(S)][None, :, :]        # (1, S, H)
    emb = item_emb if cfg.ablate == 1 else item_emb + pos_emb     # (B, S, H)

    return fused_forward_call(emb, am_k, am_q, params, cfg)       # last encoded layer


# ----------------------------------------------------------------------------
# Deterministic parameter init (normal(0,0.02), zero biases, LN gamma=1 beta=0).
# Linear weights stored as (in, out) -> y = x @ W + b; layers stacked & packed.
# ----------------------------------------------------------------------------
def init_params(key, cfg: Config):
    std = 0.02
    H, I, L = cfg.hidden_size, cfg.intermediate_size, cfg.num_layers
    keys = jax.random.split(key, 2 + L)

    item_emb = std * jax.random.normal(keys[0], (cfg.item_size, H), jnp.float32)
    item_emb = item_emb.at[0].set(0.0)                            # padding_idx=0
    pos_emb = std * jax.random.normal(keys[1], (cfg.max_seq_length, H), jnp.float32)

    w_attn, w1b, w2s, vecs = [], [], [], []
    zeros = jnp.zeros((H,), jnp.float32)
    ones = jnp.ones((H,), jnp.float32)
    for l in range(L):
        lk = jax.random.split(keys[2 + l], 6)
        wq, wk, wv, wo = (std * jax.random.normal(lk[i], (H, H), jnp.float32)
                          for i in range(4))
        w1 = std * jax.random.normal(lk[4], (H, I), jnp.float32)
        w2 = std * jax.random.normal(lk[5], (I, H), jnp.float32)
        w_attn.append(jnp.concatenate([wq, wk, wv, wo], axis=1))                 # (H, 4H)
        w1b.append(jnp.concatenate([w1, jnp.zeros((1, I), jnp.float32)], axis=0))  # (H+1, I)
        w2s.append(w2)
        # rows: bq bk bv bo ln1_g ln1_b b2 ln2_g ln2_b
        vecs.append(jnp.stack([zeros, zeros, zeros, zeros, ones, zeros, zeros, ones, zeros]))

    emb_ln = jnp.stack([ones, zeros])                                            # (2, H)
    return dict(item_emb=item_emb, pos_emb=pos_emb, emb_ln=emb_ln,
                w_attn=jnp.stack(w_attn), w1b=jnp.stack(w1b),
                w2=jnp.stack(w2s), vec=jnp.stack(vecs))


# ----------------------------------------------------------------------------
# Pure-JAX reference (same math, exact softmax divide, two-pass LN).
# ----------------------------------------------------------------------------
def reference_forward(params, input_ids, cfg: Config):
    B, S = input_ids.shape
    H = cfg.hidden_size
    hd = H // cfg.num_heads

    def lnorm(v, g, b):
        u = v.mean(-1, keepdims=True)
        s = ((v - u) ** 2).mean(-1, keepdims=True)
        return (v - u) / jnp.sqrt(s + LN_EPS) * g + b

    mask = (input_ids > 0).astype(jnp.float32)
    ext = mask[:, None, :]
    if cfg.use_causalmask == 1:
        ext = ext * jnp.tril(jnp.ones((S, S), jnp.float32))[None]
    else:
        ext = jnp.broadcast_to(ext, (B, S, S))
    ext = (1.0 - ext) * -10000.0

    item_emb = params["item_emb"][input_ids]
    pos_emb = params["pos_emb"][jnp.arange(S)][None]
    emb = item_emb if cfg.ablate == 1 else item_emb + pos_emb
    x = lnorm(emb, params["emb_ln"][0], params["emb_ln"][1])
    if cfg.zero_pad == 1:
        x = x * mask[:, :, None]

    for l in range(cfg.num_layers):
        wa = params["w_attn"][l]
        vec = params["vec"][l]
        wq, wk, wv, wo = (wa[:, i * H:(i + 1) * H] for i in range(4))
        q = x @ wq + vec[_BQ]
        k = x @ wk + vec[_BK]
        v = x @ wv + vec[_BV]
        ctxs = []
        for h in range(cfg.num_heads):
            sl = slice(h * hd, (h + 1) * hd)
            s = jnp.einsum("bqd,bkd->bqk", q[..., sl], k[..., sl]) / jnp.sqrt(float(hd)) + ext
            s = s - s.max(-1, keepdims=True)
            p = jnp.exp(s)
            p = p / p.sum(-1, keepdims=True)
            ctxs.append(jnp.einsum("bqk,bkd->bqd", p, v[..., sl]))
        ctx = jnp.concatenate(ctxs, axis=-1)
        h1 = lnorm(ctx @ wo + vec[_BO] + x, vec[_LN1G], vec[_LN1B])
        w1 = params["w1b"][l, :H]
        b1 = params["w1b"][l, H]
        inter = _gelu_tanh(h1 @ w1 + b1)
        x = lnorm(inter @ params["w2"][l] + vec[_B2] + h1, vec[_LN2G], vec[_LN2B])
    return x


if __name__ == "__main__":
    cfg = Config()
    root = jax.random.PRNGKey(0)
    k_params, k_ids = jax.random.split(root)

    params = init_params(k_params, cfg)

    B, S = 2, cfg.max_seq_length
    input_ids = jax.random.randint(k_ids, (B, S), 1, cfg.item_size, dtype=jnp.int32)
    input_ids = input_ids.at[1, :3].set(0)  # simulate left-padding on one row

    out = our_recommender_forward(params, input_ids, cfg)
    out = jax.block_until_ready(out)

    ref = reference_forward(params, input_ids, cfg)
    assert out.shape == (B, S, cfg.hidden_size)
    # tolerance accommodates pl.reciprocal(approx=True) + single-pass LN statistics
    assert jnp.allclose(out, ref, atol=1e-3, rtol=1e-3), (
        float(jnp.max(jnp.abs(out - ref))))

    print("KERNEL_OK")
</pallas_src>

<mosaic_0001>
module attributes {stable_mosaic.version = 11 : i64} {
  func.func @fused_forward_kernel(%arg0: i32, %arg1: memref<1x8x32xf32, #tpu.memory_space<vmem>>, %arg2: memref<1x1x8xf32, #tpu.memory_space<vmem>>, %arg3: memref<1x8x1xf32, #tpu.memory_space<vmem>>, %arg4: memref<2x32xf32, #tpu.memory_space<vmem>>, %arg5: memref<2x32x128xf32, #tpu.memory_space<vmem>>, %arg6: memref<2x33x128xf32, #tpu.memory_space<vmem>>, %arg7: memref<2x128x32xf32, #tpu.memory_space<vmem>>, %arg8: memref<2x9x32xf32, #tpu.memory_space<vmem>>, %arg9: memref<1x8x32xf32, #tpu.memory_space<vmem>>) attributes {dimension_semantics = [#tpu.dimension_semantics<parallel>], iteration_bounds = array<i64: 2>, scalar_prefetch = 0 : i64, scratch_operands = 0 : i64, tpu.core_type = #tpu.core_type<tc>, window_params = [{transform_indices = @transform_0, window_bounds = array<i64: 1, 8, 32>}, {transform_indices = @transform_1, window_bounds = array<i64: 1, 1, 8>}, {transform_indices = @transform_2, window_bounds = array<i64: 1, 8, 1>}, {pipeline_mode = #tpu.pipeline_mode<synchronous>, transform_indices = @transform_3, window_bounds = array<i64: 2, 32>}, {pipeline_mode = #tpu.pipeline_mode<synchronous>, transform_indices = @transform_4, window_bounds = array<i64: 2, 32, 128>}, {pipeline_mode = #tpu.pipeline_mode<synchronous>, transform_indices = @transform_5, window_bounds = array<i64: 2, 33, 128>}, {pipeline_mode = #tpu.pipeline_mode<synchronous>, transform_indices = @transform_6, window_bounds = array<i64: 2, 128, 32>}, {pipeline_mode = #tpu.pipeline_mode<synchronous>, transform_indices = @transform_7, window_bounds = array<i64: 2, 9, 32>}, {transform_indices = @transform_8, window_bounds = array<i64: 1, 8, 32>}]} {
    %c0 = arith.constant 0 : index
    %c0_0 = arith.constant 0 : index
    %c0_1 = arith.constant 0 : index
    %0 = vector.load %arg2[%c0, %c0_0, %c0_1] : memref<1x1x8xf32, #tpu.memory_space<vmem>>, vector<1x1x8xf32>
    %1 = tpu.iota {dimensions = array<i32: 0>} : vector<8x8xi32>
    %2 = tpu.iota {dimensions = array<i32: 1>} : vector<8x8xi32>
    %3 = arith.cmpi sle, %2, %1 : vector<8x8xi32>
    %4 = arith.extui %3 : vector<8x8xi1> to vector<8x8xi32>
    %5 = arith.sitofp %4 : vector<8x8xi32> to vector<8x8xf32>
    %6 = vector.shape_cast %5 : vector<8x8xf32> to vector<1x8x8xf32>
    %7 = vector.broadcast %0 : vector<1x1x8xf32> to vector<1x8x8xf32>
    %8 = arith.mulf %7, %6 : vector<1x8x8xf32>
    %cst = arith.constant 1.000000e+00 : f32
    %9 = vector.broadcast %cst : f32 to vector<1x8x8xf32>
    %10 = arith.subf %9, %8 : vector<1x8x8xf32>
    %cst_2 = arith.constant -1.000000e+04 : f32
    %11 = vector.broadcast %cst_2 : f32 to vector<1x8x8xf32>
    %12 = arith.mulf %10, %11 : vector<1x8x8xf32>
    %c0_3 = arith.constant 0 : index
    %c0_4 = arith.constant 0 : index
    %c0_5 = arith.constant 0 : index
    %13 = vector.load %arg1[%c0_3, %c0_4, %c0_5] : memref<1x8x32xf32, #tpu.memory_space<vmem>>, vector<1x8x32xf32>
    %c0_6 = arith.constant 0 : index
    %c0_7 = arith.constant 0 : index
    %14 = vector.load %arg4[%c0_6, %c0_7] : memref<2x32xf32, #tpu.memory_space<vmem>>, vector<1x32xf32>
    %c1 = arith.constant 1 : index
    %c0_8 = arith.constant 0 : index
    %15 = vector.load %arg4[%c1, %c0_8] : memref<2x32xf32, #tpu.memory_space<vmem>>, vector<1x32xf32>
    %cst_9 = arith.constant dense<0.000000e+00> : vector<1x8xf32>
    %16 = vector.multi_reduction <add>, %13, %cst_9 [2] : vector<1x8x32xf32> to vector<1x8xf32>
    %17 = vector.shape_cast %16 : vector<1x8xf32> to vector<1x8x1xf32>
    %cst_10 = arith.constant 3.200000e+01 : f32
    %18 = vector.broadcast %cst_10 : f32 to vector<1x8x1xf32>
    %19 = arith.divf %17, %18 : vector<1x8x1xf32>
    %20 = arith.mulf %13, %13 : vector<1x8x32xf32>
    %cst_11 = arith.constant dense<0.000000e+00> : vector<1x8xf32>
    %21 = vector.multi_reduction <add>, %20, %cst_11 [2] : vector<1x8x32xf32> to vector<1x8xf32>
    %22 = vector.shape_cast %21 : vector<1x8xf32> to vector<1x8x1xf32>
    %cst_12 = arith.constant 3.200000e+01 : f32
    %23 = vector.broadcast %cst_12 : f32 to vector<1x8x1xf32>
    %24 = arith.divf %22, %23 : vector<1x8x1xf32>
    %25 = arith.mulf %19, %19 : vector<1x8x1xf32>
    %26 = arith.subf %24, %25 : vector<1x8x1xf32>
    %cst_13 = arith.constant 0.000000e+00 : f32
    %27 = vector.broadcast %cst_13 : f32 to vector<1x8x1xf32>
    %28 = arith.maximumf %26, %27 : vector<1x8x1xf32>
    %29 = vector.broadcast %19 : vector<1x8x1xf32> to vector<1x8x32xf32>
    %30 = arith.subf %13, %29 : vector<1x8x32xf32>
    %cst_14 = arith.constant 9.99999996E-13 : f32
    %31 = vector.broadcast %cst_14 : f32 to vector<1x8x1xf32>
    %32 = arith.addf %28, %31 : vector<1x8x1xf32>
    %33 = math.rsqrt %32 : vector<1x8x1xf32>
    %34 = vector.broadcast %33 : vector<1x8x1xf32> to vector<1x8x32xf32>
    %35 = arith.mulf %30, %34 : vector<1x8x32xf32>
    %36 = vector.shape_cast %14 : vector<1x32xf32> to vector<1x1x32xf32>
    %37 = vector.broadcast %36 : vector<1x1x32xf32> to vector<1x8x32xf32>
    %38 = arith.mulf %35, %37 : vector<1x8x32xf32>
    %39 = vector.shape_cast %15 : vector<1x32xf32> to vector<1x1x32xf32>
    %40 = vector.broadcast %39 : vector<1x1x32xf32> to vector<1x8x32xf32>
    %41 = arith.addf %38, %40 : vector<1x8x32xf32>
    %c0_15 = arith.constant 0 : index
    %c0_16 = arith.constant 0 : index
    %c0_17 = arith.constant 0 : index
    %42 = vector.load %arg3[%c0_15, %c0_16, %c0_17] : memref<1x8x1xf32, #tpu.memory_space<vmem>>, vector<1x8x1xf32>
    %43 = vector.broadcast %42 : vector<1x8x1xf32> to vector<1x8x32xf32>
    %44 = arith.mulf %41, %43 : vector<1x8x32xf32>
    %45 = vector.shape_cast %44 : vector<1x8x32xf32> to vector<8x32xf32>
    %c0_18 = arith.constant 0 : index
    %c0_19 = arith.constant 0 : index
    %c0_20 = arith.constant 0 : index
    %46 = vector.load %arg5[%c0_18, %c0_19, %c0_20] : memref<2x32x128xf32, #tpu.memory_space<vmem>>, vector<1x32x128xf32>
    %47 = vector.shape_cast %46 : vector<1x32x128xf32> to vector<32x128xf32>
    %cst_21 = arith.constant dense<0.000000e+00> : vector<8x128xf32>
    %48 = tpu.matmul %45, %47, %cst_21 {dimension_numbers = #tpu.dot_dimension_numbers<[1], [0], [0], [1], [0, 0, 1, 1], [], []>} : vector<8x32xf32>, vector<32x128xf32>, vector<8x128xf32> -> vector<8x128xf32>
    %49 = vector.extract_strided_slice %48 {offsets = [0, 0], sizes = [8, 32], strides = [1, 1]} : vector<8x128xf32> to vector<8x32xf32>
    %c0_22 = arith.constant 0 : index
    %c0_23 = arith.constant 0 : index
    %c0_24 = arith.constant 0 : index
    %50 = vector.load %arg8[%c0_22, %c0_23, %c0_24] : memref<2x9x32xf32, #tpu.memory_space<vmem>>, vector<1x1x32xf32>
    %51 = vector.shape_cast %50 : vector<1x1x32xf32> to vector<1x32xf32>
    %52 = vector.broadcast %51 : vector<1x32xf32> to vector<8x32xf32>
    %53 = arith.addf %49, %52 : vector<8x32xf32>
    %54 = vector.shape_cast %53 : vector<8x32xf32> to vector<1x8x32xf32>
    %55 = vector.extract_strided_slice %48 {offsets = [0, 32], sizes = [8, 32], strides = [1, 1]} : vector<8x128xf32> to vector<8x32xf32>
    %c0_25 = arith.constant 0 : index
    %c1_26 = arith.constant 1 : index
    %c0_27 = arith.constant 0 : index
    %56 = vector.load %arg8[%c0_25, %c1_26, %c0_27] : memref<2x9x32xf32, #tpu.memory_space<vmem>>, vector<1x1x32xf32>
    %57 = vector.shape_cast %56 : vector<1x1x32xf32> to vector<1x32xf32>
    %58 = vector.broadcast %57 : vector<1x32xf32> to vector<8x32xf32>
    %59 = arith.addf %55, %58 : vector<8x32xf32>
    %60 = vector.shape_cast %59 : vector<8x32xf32> to vector<1x8x32xf32>
    %61 = vector.extract_strided_slice %48 {offsets = [0, 64], sizes = [8, 32], strides = [1, 1]} : vector<8x128xf32> to vector<8x32xf32>
    %c0_28 = arith.constant 0 : index
    %c2 = arith.constant 2 : index
    %c0_29 = arith.constant 0 : index
    %62 = vector.load %arg8[%c0_28, %c2, %c0_29] : memref<2x9x32xf32, #tpu.memory_space<vmem>>, vector<1x1x32xf32>
    %63 = vector.shape_cast %62 : vector<1x1x32xf32> to vector<1x32xf32>
    %64 = vector.broadcast %63 : vector<1x32xf32> to vector<8x32xf32>
    %65 = arith.addf %61, %64 : vector<8x32xf32>
    %66 = vector.shape_cast %65 : vector<8x32xf32> to vector<1x8x32xf32>
    %67 = vector.extract_strided_slice %54 {offsets = [0, 0, 0], sizes = [1, 8, 16], strides = [1, 1, 1]} : vector<1x8x32xf32> to vector<1x8x16xf32>
    %68 = vector.extract_strided_slice %60 {offsets = [0, 0, 0], sizes = [1, 8, 16], strides = [1, 1, 1]} : vector<1x8x32xf32> to vector<1x8x16xf32>
    %69 = vector.extract_strided_slice %66 {offsets = [0, 0, 0], sizes = [1, 8, 16], strides = [1, 1, 1]} : vector<1x8x32xf32> to vector<1x8x16xf32>
    "tpu.trace_start"() <{level = 10 : i32, message = "bqd,bkd->bqk"}> : () -> ()
    %cst_30 = arith.constant dense<0.000000e+00> : vector<1x8x8xf32>
    %70 = tpu.matmul %67, %68, %cst_30 {dimension_numbers = #tpu.dot_dimension_numbers<[2], [2], [1], [1], [0, 0, 0, 1, 1, 1], [0], [0]>} : vector<1x8x16xf32>, vector<1x8x16xf32>, vector<1x8x8xf32> -> vector<1x8x8xf32>
    "tpu.trace_stop"() : () -> ()
    %cst_31 = arith.constant 2.500000e-01 : f32
    %71 = vector.broadcast %cst_31 : f32 to vector<1x8x8xf32>
    %72 = arith.mulf %70, %71 : vector<1x8x8xf32>
    %73 = arith.addf %72, %12 : vector<1x8x8xf32>
    %cst_32 = arith.constant dense<0xFF800000> : vector<1x8xf32>
    %74 = vector.multi_reduction <maximumf>, %73, %cst_32 [2] : vector<1x8x8xf32> to vector<1x8xf32>
    %75 = vector.shape_cast %74 : vector<1x8xf32> to vector<1x8x1xf32>
    %76 = vector.broadcast %75 : vector<1x8x1xf32> to vector<1x8x8xf32>
    %77 = arith.subf %73, %76 : vector<1x8x8xf32>
    %78 = math.exp %77 : vector<1x8x8xf32>
    %cst_33 = arith.constant dense<0.000000e+00> : vector<1x8xf32>
    %79 = vector.multi_reduction <add>, %78, %cst_33 [2] : vector<1x8x8xf32> to vector<1x8xf32>
    %80 = vector.shape_cast %79 : vector<1x8xf32> to vector<1x8x1xf32>
    %81 = tpu.reciprocal %80 {approx = true} : vector<1x8x1xf32> -> vector<1x8x1xf32>
    %82 = vector.broadcast %81 : vector<1x8x1xf32> to vector<1x8x8xf32>
    %83 = arith.mulf %78, %82 : vector<1x8x8xf32>
    "tpu.trace_start"() <{level = 10 : i32, message = "bqk,bkd->bqd"}> : () -> ()
    %cst_34 = arith.constant dense<0.000000e+00> : vector<1x8x16xf32>
    %84 = tpu.matmul %83, %69, %cst_34 {dimension_numbers = #tpu.dot_dimension_numbers<[2], [1], [1], [2], [0, 0, 0, 1, 1, 2], [0], [0]>} : vector<1x8x8xf32>, vector<1x8x16xf32>, vector<1x8x16xf32> -> vector<1x8x16xf32>
    "tpu.trace_stop"() : () -> ()
    %85 = vector.shape_cast %84 : vector<1x8x16xf32> to vector<8x16xf32>
    %c0_35 = arith.constant 0 : index
    %c0_36 = arith.constant 0 : index
    %c96 = arith.constant 96 : index
    %86 = vector.load %arg5[%c0_35, %c0_36, %c96] : memref<2x32x128xf32, #tpu.memory_space<vmem>>, vector<1x16x32xf32>
    %87 = vector.shape_cast %86 : vector<1x16x32xf32> to vector<16x32xf32>
    %cst_37 = arith.constant dense<0.000000e+00> : vector<8x32xf32>
    %88 = tpu.matmul %85, %87, %cst_37 {dimension_numbers = #tpu.dot_dimension_numbers<[1], [0], [0], [1], [0, 0, 1, 1], [], []>} : vector<8x16xf32>, vector<16x32xf32>, vector<8x32xf32> -> vector<8x32xf32>
    %89 = vector.extract_strided_slice %54 {offsets = [0, 0, 16], sizes = [1, 8, 16], strides = [1, 1, 1]} : vector<1x8x32xf32> to vector<1x8x16xf32>
    %90 = vector.extract_strided_slice %60 {offsets = [0, 0, 16], sizes = [1, 8, 16], strides = [1, 1, 1]} : vector<1x8x32xf32> to vector<1x8x16xf32>
    %91 = vector.extract_strided_slice %66 {offsets = [0, 0, 16], sizes = [1, 8, 16], strides = [1, 1, 1]} : vector<1x8x32xf32> to vector<1x8x16xf32>
    "tpu.trace_start"() <{level = 10 : i32, message = "bqd,bkd->bqk"}> : () -> ()
    %cst_38 = arith.constant dense<0.000000e+00> : vector<1x8x8xf32>
    %92 = tpu.matmul %89, %90, %cst_38 {dimension_numbers = #tpu.dot_dimension_numbers<[2], [2], [1], [1], [0, 0, 0, 1, 1, 1], [0], [0]>} : vector<1x8x16xf32>, vector<1x8x16xf32>, vector<1x8x8xf32> -> vector<1x8x8xf32>
    "tpu.trace_stop"() : () -> ()
    %cst_39 = arith.constant 2.500000e-01 : f32
    %93 = vector.broadcast %cst_39 : f32 to vector<1x8x8xf32>
    %94 = arith.mulf %92, %93 : vector<1x8x8xf32>
    %95 = arith.addf %94, %12 : vector<1x8x8xf32>
    %cst_40 = arith.constant dense<0xFF800000> : vector<1x8xf32>
    %96 = vector.multi_reduction <maximumf>, %95, %cst_40 [2] : vector<1x8x8xf32> to vector<1x8xf32>
    %97 = vector.shape_cast %96 : vector<1x8xf32> to vector<1x8x1xf32>
    %98 = vector.broadcast %97 : vector<1x8x1xf32> to vector<1x8x8xf32>
    %99 = arith.subf %95, %98 : vector<1x8x8xf32>
    %100 = math.exp %99 : vector<1x8x8xf32>
    %cst_41 = arith.constant dense<0.000000e+00> : vector<1x8xf32>
    %101 = vector.multi_reduction <add>, %100, %cst_41 [2] : vector<1x8x8xf32> to vector<1x8xf32>
    %102 = vector.shape_cast %101 : vector<1x8xf32> to vector<1x8x1xf32>
    %103 = tpu.reciprocal %102 {approx = true} : vector<1x8x1xf32> -> vector<1x8x1xf32>
    %104 = vector.broadcast %103 : vector<1x8x1xf32> to vector<1x8x8xf32>
    %105 = arith.mulf %100, %104 : vector<1x8x8xf32>
    "tpu.trace_start"() <{level = 10 : i32, message = "bqk,bkd->bqd"}> : () -> ()
    %cst_42 = arith.constant dense<0.000000e+00> : vector<1x8x16xf32>
    %106 = tpu.matmul %105, %91, %cst_42 {dimension_numbers = #tpu.dot_dimension_numbers<[2], [1], [1], [2], [0, 0, 0, 1, 1, 2], [0], [0]>} : vector<1x8x8xf32>, vector<1x8x16xf32>, vector<1x8x16xf32> -> vector<1x8x16xf32>
    "tpu.trace_stop"() : () -> ()
    %107 = vector.shape_cast %106 : vector<1x8x16xf32> to vector<8x16xf32>
    %c0_43 = arith.constant 0 : index
    %c16 = arith.constant 16 : index
    %c96_44 = arith.constant 96 : index
    %108 = vector.load %arg5[%c0_43, %c16, %c96_44] : memref<2x32x128xf32, #tpu.memory_space<vmem>>, vector<1x16x32xf32>
    %109 = vector.shape_cast %108 : vector<1x16x32xf32> to vector<16x32xf32>
    %cst_45 = arith.constant dense<0.000000e+00> : vector<8x32xf32>
    %110 = tpu.matmul %107, %109, %cst_45 {dimension_numbers = #tpu.dot_dimension_numbers<[1], [0], [0], [1], [0, 0, 1, 1], [], []>} : vector<8x16xf32>, vector<16x32xf32>, vector<8x32xf32> -> vector<8x32xf32>
    %111 = arith.addf %88, %110 : vector<8x32xf32>
    %c0_46 = arith.constant 0 : index
    %c3 = arith.constant 3 : index
    %c0_47 = arith.constant 0 : index
    %112 = vector.load %arg8[%c0_46, %c3, %c0_47] : memref<2x9x32xf32, #tpu.memory_space<vmem>>, vector<1x1x32xf32>
    %113 = vector.shape_cast %112 : vector<1x1x32xf32> to vector<1x32xf32>
    %114 = vector.broadcast %113 : vector<1x32xf32> to vector<8x32xf32>
    %115 = arith.addf %111, %114 : vector<8x32xf32>
    %116 = arith.addf %115, %45 : vector<8x32xf32>
    %c0_48 = arith.constant 0 : index
    %c4 = arith.constant 4 : index
    %c0_49 = arith.constant 0 : index
    %117 = vector.load %arg8[%c0_48, %c4, %c0_49] : memref<2x9x32xf32, #tpu.memory_space<vmem>>, vector<1x1x32xf32>
    %118 = vector.shape_cast %117 : vector<1x1x32xf32> to vector<1x32xf32>
    %c0_50 = arith.constant 0 : index
    %c5 = arith.constant 5 : index
    %c0_51 = arith.constant 0 : index
    %119 = vector.load %arg8[%c0_50, %c5, %c0_51] : memref<2x9x32xf32, #tpu.memory_space<vmem>>, vector<1x1x32xf32>
    %120 = vector.shape_cast %119 : vector<1x1x32xf32> to vector<1x32xf32>
    %cst_52 = arith.constant dense<0.000000e+00> : vector<8xf32>
    %121 = vector.multi_reduction <add>, %116, %cst_52 [1] : vector<8x32xf32> to vector<8xf32>
    %122 = vector.shape_cast %121 : vector<8xf32> to vector<8x1xf32>
    %cst_53 = arith.constant 3.200000e+01 : f32
    %123 = vector.broadcast %cst_53 : f32 to vector<8x1xf32>
    %124 = arith.divf %122, %123 : vector<8x1xf32>
    %125 = arith.mulf %116, %116 : vector<8x32xf32>
    %cst_54 = arith.constant dense<0.000000e+00> : vector<8xf32>
    %126 = vector.multi_reduction <add>, %125, %cst_54 [1] : vector<8x32xf32> to vector<8xf32>
    %127 = vector.shape_cast %126 : vector<8xf32> to vector<8x1xf32>
    %cst_55 = arith.constant 3.200000e+01 : f32
    %128 = vector.broadcast %cst_55 : f32 to vector<8x1xf32>
    %129 = arith.divf %127, %128 : vector<8x1xf32>
    %130 = arith.mulf %124, %124 : vector<8x1xf32>
    %131 = arith.subf %129, %130 : vector<8x1xf32>
    %cst_56 = arith.constant 0.000000e+00 : f32
    %132 = vector.broadcast %cst_56 : f32 to vector<8x1xf32>
    %133 = arith.maximumf %131, %132 : vector<8x1xf32>
    %134 = vector.broadcast %124 : vector<8x1xf32> to vector<8x32xf32>
    %135 = arith.subf %116, %134 : vector<8x32xf32>
    %cst_57 = arith.constant 9.99999996E-13 : f32
    %136 = vector.broadcast %cst_57 : f32 to vector<8x1xf32>
    %137 = arith.addf %133, %136 : vector<8x1xf32>
    %138 = math.rsqrt %137 : vector<8x1xf32>
    %139 = vector.broadcast %138 : vector<8x1xf32> to vector<8x32xf32>
    %140 = arith.mulf %135, %139 : vector<8x32xf32>
    %141 = vector.broadcast %118 : vector<1x32xf32> to vector<8x32xf32>
    %142 = arith.mulf %140, %141 : vector<8x32xf32>
    %143 = vector.broadcast %120 : vector<1x32xf32> to vector<8x32xf32>
    %144 = arith.addf %142, %143 : vector<8x32xf32>
    %c0_58 = arith.constant 0 : index
    %c0_59 = arith.constant 0 : index
    %c0_60 = arith.constant 0 : index
    %145 = vector.load %arg6[%c0_58, %c0_59, %c0_60] : memref<2x33x128xf32, #tpu.memory_space<vmem>>, vector<1x32x128xf32>
    %146 = vector.shape_cast %145 : vector<1x32x128xf32> to vector<32x128xf32>
    %cst_61 = arith.constant dense<0.000000e+00> : vector<8x128xf32>
    %147 = tpu.matmul %144, %146, %cst_61 {dimension_numbers = #tpu.dot_dimension_numbers<[1], [0], [0], [1], [0, 0, 1, 1], [], []>} : vector<8x32xf32>, vector<32x128xf32>, vector<8x128xf32> -> vector<8x128xf32>
    %c0_62 = arith.constant 0 : index
    %c32 = arith.constant 32 : index
    %c0_63 = arith.constant 0 : index
    %148 = vector.load %arg6[%c0_62, %c32, %c0_63] : memref<2x33x128xf32, #tpu.memory_space<vmem>>, vector<1x1x128xf32>
    %149 = vector.shape_cast %148 : vector<1x1x128xf32> to vector<1x128xf32>
    %150 = vector.broadcast %149 : vector<1x128xf32> to vector<8x128xf32>
    %151 = arith.addf %147, %150 : vector<8x128xf32>
    %cst_64 = arith.constant 5.000000e-01 : f32
    %152 = vector.broadcast %cst_64 : f32 to vector<8x128xf32>
    %153 = arith.mulf %152, %151 : vector<8x128xf32>
    %cst_65 = arith.constant 4.471500e-02 : f32
    %154 = vector.broadcast %cst_65 : f32 to vector<8x128xf32>
    %155 = arith.mulf %154, %151 : vector<8x128xf32>
    %156 = arith.mulf %155, %151 : vector<8x128xf32>
    %157 = arith.mulf %156, %151 : vector<8x128xf32>
    %158 = arith.addf %151, %157 : vector<8x128xf32>
    %cst_66 = arith.constant 0.797884583 : f32
    %159 = vector.broadcast %cst_66 : f32 to vector<8x128xf32>
    %160 = arith.mulf %159, %158 : vector<8x128xf32>
    %161 = math.tanh %160 : vector<8x128xf32>
    %cst_67 = arith.constant 1.000000e+00 : f32
    %162 = vector.broadcast %cst_67 : f32 to vector<8x128xf32>
    %163 = arith.addf %162, %161 : vector<8x128xf32>
    %164 = arith.mulf %153, %163 : vector<8x128xf32>
    %c0_68 = arith.constant 0 : index
    %c0_69 = arith.constant 0 : index
    %c0_70 = arith.constant 0 : index
    %165 = vector.load %arg7[%c0_68, %c0_69, %c0_70] : memref<2x128x32xf32, #tpu.memory_space<vmem>>, vector<1x128x32xf32>
    %166 = vector.shape_cast %165 : vector<1x128x32xf32> to vector<128x32xf32>
    %cst_71 = arith.constant dense<0.000000e+00> : vector<8x32xf32>
    %167 = tpu.matmul %164, %166, %cst_71 {dimension_numbers = #tpu.dot_dimension_numbers<[1], [0], [0], [1], [0, 0, 1, 1], [], []>} : vector<8x128xf32>, vector<128x32xf32>, vector<8x32xf32> -> vector<8x32xf32>
    %c0_72 = arith.constant 0 : index
    %c6 = arith.constant 6 : index
    %c0_73 = arith.constant 0 : index
    %168 = vector.load %arg8[%c0_72, %c6, %c0_73] : memref<2x9x32xf32, #tpu.memory_space<vmem>>, vector<1x1x32xf32>
    %169 = vector.shape_cast %168 : vector<1x1x32xf32> to vector<1x32xf32>
    %170 = vector.broadcast %169 : vector<1x32xf32> to vector<8x32xf32>
    %171 = arith.addf %167, %170 : vector<8x32xf32>
    %172 = arith.addf %171, %144 : vector<8x32xf32>
    %c0_74 = arith.constant 0 : index
    %c7 = arith.constant 7 : index
    %c0_75 = arith.constant 0 : index
    %173 = vector.load %arg8[%c0_74, %c7, %c0_75] : memref<2x9x32xf32, #tpu.memory_space<vmem>>, vector<1x1x32xf32>
    %174 = vector.shape_cast %173 : vector<1x1x32xf32> to vector<1x32xf32>
    %c0_76 = arith.constant 0 : index
    %c8 = arith.constant 8 : index
    %c0_77 = arith.constant 0 : index
    %175 = vector.load %arg8[%c0_76, %c8, %c0_77] : memref<2x9x32xf32, #tpu.memory_space<vmem>>, vector<1x1x32xf32>
    %176 = vector.shape_cast %175 : vector<1x1x32xf32> to vector<1x32xf32>
    %cst_78 = arith.constant dense<0.000000e+00> : vector<8xf32>
    %177 = vector.multi_reduction <add>, %172, %cst_78 [1] : vector<8x32xf32> to vector<8xf32>
    %178 = vector.shape_cast %177 : vector<8xf32> to vector<8x1xf32>
    %cst_79 = arith.constant 3.200000e+01 : f32
    %179 = vector.broadcast %cst_79 : f32 to vector<8x1xf32>
    %180 = arith.divf %178, %179 : vector<8x1xf32>
    %181 = arith.mulf %172, %172 : vector<8x32xf32>
    %cst_80 = arith.constant dense<0.000000e+00> : vector<8xf32>
    %182 = vector.multi_reduction <add>, %181, %cst_80 [1] : vector<8x32xf32> to vector<8xf32>
    %183 = vector.shape_cast %182 : vector<8xf32> to vector<8x1xf32>
    %cst_81 = arith.constant 3.200000e+01 : f32
    %184 = vector.broadcast %cst_81 : f32 to vector<8x1xf32>
    %185 = arith.divf %183, %184 : vector<8x1xf32>
    %186 = arith.mulf %180, %180 : vector<8x1xf32>
    %187 = arith.subf %185, %186 : vector<8x1xf32>
    %cst_82 = arith.constant 0.000000e+00 : f32
    %188 = vector.broadcast %cst_82 : f32 to vector<8x1xf32>
    %189 = arith.maximumf %187, %188 : vector<8x1xf32>
    %190 = vector.broadcast %180 : vector<8x1xf32> to vector<8x32xf32>
    %191 = arith.subf %172, %190 : vector<8x32xf32>
    %cst_83 = arith.constant 9.99999996E-13 : f32
    %192 = vector.broadcast %cst_83 : f32 to vector<8x1xf32>
    %193 = arith.addf %189, %192 : vector<8x1xf32>
    %194 = math.rsqrt %193 : vector<8x1xf32>
    %195 = vector.broadcast %194 : vector<8x1xf32> to vector<8x32xf32>
    %196 = arith.mulf %191, %195 : vector<8x32xf32>
    %197 = vector.broadcast %174 : vector<1x32xf32> to vector<8x32xf32>
    %198 = arith.mulf %196, %197 : vector<8x32xf32>
    %199 = vector.broadcast %176 : vector<1x32xf32> to vector<8x32xf32>
    %200 = arith.addf %198, %199 : vector<8x32xf32>
    %c1_84 = arith.constant 1 : index
    %c0_85 = arith.constant 0 : index
    %c0_86 = arith.constant 0 : index
    %201 = vector.load %arg5[%c1_84, %c0_85, %c0_86] : memref<2x32x128xf32, #tpu.memory_space<vmem>>, vector<1x32x128xf32>
    %202 = vector.shape_cast %201 : vector<1x32x128xf32> to vector<32x128xf32>
    %cst_87 = arith.constant dense<0.000000e+00> : vector<8x128xf32>
    %203 = tpu.matmul %200, %202, %cst_87 {dimension_numbers = #tpu.dot_dimension_numbers<[1], [0], [0], [1], [0, 0, 1, 1], [], []>} : vector<8x32xf32>, vector<32x128xf32>, vector<8x128xf32> -> vector<8x128xf32>
    %204 = vector.extract_strided_slice %203 {offsets = [0, 0], sizes = [8, 32], strides = [1, 1]} : vector<8x128xf32> to vector<8x32xf32>
    %c1_88 = arith.constant 1 : index
    %c0_89 = arith.constant 0 : index
    %c0_90 = arith.constant 0 : index
    %205 = vector.load %arg8[%c1_88, %c0_89, %c0_90] : memref<2x9x32xf32, #tpu.memory_space<vmem>>, vector<1x1x32xf32>
    %206 = vector.shape_cast %205 : vector<1x1x32xf32> to vector<1x32xf32>
    %207 = vector.broadcast %206 : vector<1x32xf32> to vector<8x32xf32>
    %208 = arith.addf %204, %207 : vector<8x32xf32>
    %209 = vector.shape_cast %208 : vector<8x32xf32> to vector<1x8x32xf32>
    %210 = vector.extract_strided_slice %203 {offsets = [0, 32], sizes = [8, 32], strides = [1, 1]} : vector<8x128xf32> to vector<8x32xf32>
    %c1_91 = arith.constant 1 : index
    %c1_92 = arith.constant 1 : index
    %c0_93 = arith.constant 0 : index
    %211 = vector.load %arg8[%c1_91, %c1_92, %c0_93] : memref<2x9x32xf32, #tpu.memory_space<vmem>>, vector<1x1x32xf32>
    %212 = vector.shape_cast %211 : vector<1x1x32xf32> to vector<1x32xf32>
    %213 = vector.broadcast %212 : vector<1x32xf32> to vector<8x32xf32>
    %214 = arith.addf %210, %213 : vector<8x32xf32>
    %215 = vector.shape_cast %214 : vector<8x32xf32> to vector<1x8x32xf32>
    %216 = vector.extract_strided_slice %203 {offsets = [0, 64], sizes = [8, 32], strides = [1, 1]} : vector<8x128xf32> to vector<8x32xf32>
    %c1_94 = arith.constant 1 : index
    %c2_95 = arith.constant 2 : index
    %c0_96 = arith.constant 0 : index
    %217 = vector.load %arg8[%c1_94, %c2_95, %c0_96] : memref<2x9x32xf32, #tpu.memory_space<vmem>>, vector<1x1x32xf32>
    %218 = vector.shape_cast %217 : vector<1x1x32xf32> to vector<1x32xf32>
    %219 = vector.broadcast %218 : vector<1x32xf32> to vector<8x32xf32>
    %220 = arith.addf %216, %219 : vector<8x32xf32>
    %221 = vector.shape_cast %220 : vector<8x32xf32> to vector<1x8x32xf32>
    %222 = vector.extract_strided_slice %209 {offsets = [0, 0, 0], sizes = [1, 8, 16], strides = [1, 1, 1]} : vector<1x8x32xf32> to vector<1x8x16xf32>
    %223 = vector.extract_strided_slice %215 {offsets = [0, 0, 0], sizes = [1, 8, 16], strides = [1, 1, 1]} : vector<1x8x32xf32> to vector<1x8x16xf32>
    %224 = vector.extract_strided_slice %221 {offsets = [0, 0, 0], sizes = [1, 8, 16], strides = [1, 1, 1]} : vector<1x8x32xf32> to vector<1x8x16xf32>
    "tpu.trace_start"() <{level = 10 : i32, message = "bqd,bkd->bqk"}> : () -> ()
    %cst_97 = arith.constant dense<0.000000e+00> : vector<1x8x8xf32>
    %225 = tpu.matmul %222, %223, %cst_97 {dimension_numbers = #tpu.dot_dimension_numbers<[2], [2], [1], [1], [0, 0, 0, 1, 1, 1], [0], [0]>} : vector<1x8x16xf32>, vector<1x8x16xf32>, vector<1x8x8xf32> -> vector<1x8x8xf32>
    "tpu.trace_stop"() : () -> ()
    %cst_98 = arith.constant 2.500000e-01 : f32
    %226 = vector.broadcast %cst_98 : f32 to vector<1x8x8xf32>
    %227 = arith.mulf %225, %226 : vector<1x8x8xf32>
    %228 = arith.addf %227, %12 : vector<1x8x8xf32>
    %cst_99 = arith.constant dense<0xFF800000> : vector<1x8xf32>
    %229 = vector.multi_reduction <maximumf>, %228, %cst_99 [2] : vector<1x8x8xf32> to vector<1x8xf32>
    %230 = vector.shape_cast %229 : vector<1x8xf32> to vector<1x8x1xf32>
    %231 = vector.broadcast %230 : vector<1x8x1xf32> to vector<1x8x8xf32>
    %232 = arith.subf %228, %231 : vector<1x8x8xf32>
    %233 = math.exp %232 : vector<1x8x8xf32>
    %cst_100 = arith.constant dense<0.000000e+00> : vector<1x8xf32>
    %234 = vector.multi_reduction <add>, %233, %cst_100 [2] : vector<1x8x8xf32> to vector<1x8xf32>
    %235 = vector.shape_cast %234 : vector<1x8xf32> to vector<1x8x1xf32>
    %236 = tpu.reciprocal %235 {approx = true} : vector<1x8x1xf32> -> vector<1x8x1xf32>
    %237 = vector.broadcast %236 : vector<1x8x1xf32> to vector<1x8x8xf32>
    %238 = arith.mulf %233, %237 : vector<1x8x8xf32>
    "tpu.trace_start"() <{level = 10 : i32, message = "bqk,bkd->bqd"}> : () -> ()
    %cst_101 = arith.constant dense<0.000000e+00> : vector<1x8x16xf32>
    %239 = tpu.matmul %238, %224, %cst_101 {dimension_numbers = #tpu.dot_dimension_numbers<[2], [1], [1], [2], [0, 0, 0, 1, 1, 2], [0], [0]>} : vector<1x8x8xf32>, vector<1x8x16xf32>, vector<1x8x16xf32> -> vector<1x8x16xf32>
    "tpu.trace_stop"() : () -> ()
    %240 = vector.shape_cast %239 : vector<1x8x16xf32> to vector<8x16xf32>
    %c1_102 = arith.constant 1 : index
    %c0_103 = arith.constant 0 : index
    %c96_104 = arith.constant 96 : index
    %241 = vector.load %arg5[%c1_102, %c0_103, %c96_104] : memref<2x32x128xf32, #tpu.memory_space<vmem>>, vector<1x16x32xf32>
    %242 = vector.shape_cast %241 : vector<1x16x32xf32> to vector<16x32xf32>
    %cst_105 = arith.constant dense<0.000000e+00> : vector<8x32xf32>
    %243 = tpu.matmul %240, %242, %cst_105 {dimension_numbers = #tpu.dot_dimension_numbers<[1], [0], [0], [1], [0, 0, 1, 1], [], []>} : vector<8x16xf32>, vector<16x32xf32>, vector<8x32xf32> -> vector<8x32xf32>
    %244 = vector.extract_strided_slice %209 {offsets = [0, 0, 16], sizes = [1, 8, 16], strides = [1, 1, 1]} : vector<1x8x32xf32> to vector<1x8x16xf32>
    %245 = vector.extract_strided_slice %215 {offsets = [0, 0, 16], sizes = [1, 8, 16], strides = [1, 1, 1]} : vector<1x8x32xf32> to vector<1x8x16xf32>
    %246 = vector.extract_strided_slice %221 {offsets = [0, 0, 16], sizes = [1, 8, 16], strides = [1, 1, 1]} : vector<1x8x32xf32> to vector<1x8x16xf32>
    "tpu.trace_start"() <{level = 10 : i32, message = "bqd,bkd->bqk"}> : () -> ()
    %cst_106 = arith.constant dense<0.000000e+00> : vector<1x8x8xf32>
    %247 = tpu.matmul %244, %245, %cst_106 {dimension_numbers = #tpu.dot_dimension_numbers<[2], [2], [1], [1], [0, 0, 0, 1, 1, 1], [0], [0]>} : vector<1x8x16xf32>, vector<1x8x16xf32>, vector<1x8x8xf32> -> vector<1x8x8xf32>
    "tpu.trace_stop"() : () -> ()
    %cst_107 = arith.constant 2.500000e-01 : f32
    %248 = vector.broadcast %cst_107 : f32 to vector<1x8x8xf32>
    %249 = arith.mulf %247, %248 : vector<1x8x8xf32>
    %250 = arith.addf %249, %12 : vector<1x8x8xf32>
    %cst_108 = arith.constant dense<0xFF800000> : vector<1x8xf32>
    %251 = vector.multi_reduction <maximumf>, %250, %cst_108 [2] : vector<1x8x8xf32> to vector<1x8xf32>
    %252 = vector.shape_cast %251 : vector<1x8xf32> to vector<1x8x1xf32>
    %253 = vector.broadcast %252 : vector<1x8x1xf32> to vector<1x8x8xf32>
    %254 = arith.subf %250, %253 : vector<1x8x8xf32>
    %255 = math.exp %254 : vector<1x8x8xf32>
    %cst_109 = arith.constant dense<0.000000e+00> : vector<1x8xf32>
    %256 = vector.multi_reduction <add>, %255, %cst_109 [2] : vector<1x8x8xf32> to vector<1x8xf32>
    %257 = vector.shape_cast %256 : vector<1x8xf32> to vector<1x8x1xf32>
    %258 = tpu.reciprocal %257 {approx = true} : vector<1x8x1xf32> -> vector<1x8x1xf32>
    %259 = vector.broadcast %258 : vector<1x8x1xf32> to vector<1x8x8xf32>
    %260 = arith.mulf %255, %259 : vector<1x8x8xf32>
    "tpu.trace_start"() <{level = 10 : i32, message = "bqk,bkd->bqd"}> : () -> ()
    %cst_110 = arith.constant dense<0.000000e+00> : vector<1x8x16xf32>
    %261 = tpu.matmul %260, %246, %cst_110 {dimension_numbers = #tpu.dot_dimension_numbers<[2], [1], [1], [2], [0, 0, 0, 1, 1, 2], [0], [0]>} : vector<1x8x8xf32>, vector<1x8x16xf32>, vector<1x8x16xf32> -> vector<1x8x16xf32>
    "tpu.trace_stop"() : () -> ()
    %262 = vector.shape_cast %261 : vector<1x8x16xf32> to vector<8x16xf32>
    %c1_111 = arith.constant 1 : index
    %c16_112 = arith.constant 16 : index
    %c96_113 = arith.constant 96 : index
    %263 = vector.load %arg5[%c1_111, %c16_112, %c96_113] : memref<2x32x128xf32, #tpu.memory_space<vmem>>, vector<1x16x32xf32>
    %264 = vector.shape_cast %263 : vector<1x16x32xf32> to vector<16x32xf32>
    %cst_114 = arith.constant dense<0.000000e+00> : vector<8x32xf32>
    %265 = tpu.matmul %262, %264, %cst_114 {dimension_numbers = #tpu.dot_dimension_numbers<[1], [0], [0], [1], [0, 0, 1, 1], [], []>} : vector<8x16xf32>, vector<16x32xf32>, vector<8x32xf32> -> vector<8x32xf32>
    %266 = arith.addf %243, %265 : vector<8x32xf32>
    %c1_115 = arith.constant 1 : index
    %c3_116 = arith.constant 3 : index
    %c0_117 = arith.constant 0 : index
    %267 = vector.load %arg8[%c1_115, %c3_116, %c0_117] : memref<2x9x32xf32, #tpu.memory_space<vmem>>, vector<1x1x32xf32>
    %268 = vector.shape_cast %267 : vector<1x1x32xf32> to vector<1x32xf32>
    %269 = vector.broadcast %268 : vector<1x32xf32> to vector<8x32xf32>
    %270 = arith.addf %266, %269 : vector<8x32xf32>
    %271 = arith.addf %270, %200 : vector<8x32xf32>
    %c1_118 = arith.constant 1 : index
    %c4_119 = arith.constant 4 : index
    %c0_120 = arith.constant 0 : index
    %272 = vector.load %arg8[%c1_118, %c4_119, %c0_120] : memref<2x9x32xf32, #tpu.memory_space<vmem>>, vector<1x1x32xf32>
    %273 = vector.shape_cast %272 : vector<1x1x32xf32> to vector<1x32xf32>
    %c1_121 = arith.constant 1 : index
    %c5_122 = arith.constant 5 : index
    %c0_123 = arith.constant 0 : index
    %274 = vector.load %arg8[%c1_121, %c5_122, %c0_123] : memref<2x9x32xf32, #tpu.memory_space<vmem>>, vector<1x1x32xf32>
    %275 = vector.shape_cast %274 : vector<1x1x32xf32> to vector<1x32xf32>
    %cst_124 = arith.constant dense<0.000000e+00> : vector<8xf32>
    %276 = vector.multi_reduction <add>, %271, %cst_124 [1] : vector<8x32xf32> to vector<8xf32>
    %277 = vector.shape_cast %276 : vector<8xf32> to vector<8x1xf32>
    %cst_125 = arith.constant 3.200000e+01 : f32
    %278 = vector.broadcast %cst_125 : f32 to vector<8x1xf32>
    %279 = arith.divf %277, %278 : vector<8x1xf32>
    %280 = arith.mulf %271, %271 : vector<8x32xf32>
    %cst_126 = arith.constant dense<0.000000e+00> : vector<8xf32>
    %281 = vector.multi_reduction <add>, %280, %cst_126 [1] : vector<8x32xf32> to vector<8xf32>
    %282 = vector.shape_cast %281 : vector<8xf32> to vector<8x1xf32>
    %cst_127 = arith.constant 3.200000e+01 : f32
    %283 = vector.broadcast %cst_127 : f32 to vector<8x1xf32>
    %284 = arith.divf %282, %283 : vector<8x1xf32>
    %285 = arith.mulf %279, %279 : vector<8x1xf32>
    %286 = arith.subf %284, %285 : vector<8x1xf32>
    %cst_128 = arith.constant 0.000000e+00 : f32
    %287 = vector.broadcast %cst_128 : f32 to vector<8x1xf32>
    %288 = arith.maximumf %286, %287 : vector<8x1xf32>
    %289 = vector.broadcast %279 : vector<8x1xf32> to vector<8x32xf32>
    %290 = arith.subf %271, %289 : vector<8x32xf32>
    %cst_129 = arith.constant 9.99999996E-13 : f32
    %291 = vector.broadcast %cst_129 : f32 to vector<8x1xf32>
    %292 = arith.addf %288, %291 : vector<8x1xf32>
    %293 = math.rsqrt %292 : vector<8x1xf32>
    %294 = vector.broadcast %293 : vector<8x1xf32> to vector<8x32xf32>
    %295 = arith.mulf %290, %294 : vector<8x32xf32>
    %296 = vector.broadcast %273 : vector<1x32xf32> to vector<8x32xf32>
    %297 = arith.mulf %295, %296 : vector<8x32xf32>
    %298 = vector.broadcast %275 : vector<1x32xf32> to vector<8x32xf32>
    %299 = arith.addf %297, %298 : vector<8x32xf32>
    %c1_130 = arith.constant 1 : index
    %c0_131 = arith.constant 0 : index
    %c0_132 = arith.constant 0 : index
    %300 = vector.load %arg6[%c1_130, %c0_131, %c0_132] : memref<2x33x128xf32, #tpu.memory_space<vmem>>, vector<1x32x128xf32>
    %301 = vector.shape_cast %300 : vector<1x32x128xf32> to vector<32x128xf32>
    %cst_133 = arith.constant dense<0.000000e+00> : vector<8x128xf32>
    %302 = tpu.matmul %299, %301, %cst_133 {dimension_numbers = #tpu.dot_dimension_numbers<[1], [0], [0], [1], [0, 0, 1, 1], [], []>} : vector<8x32xf32>, vector<32x128xf32>, vector<8x128xf32> -> vector<8x128xf32>
    %c1_134 = arith.constant 1 : index
    %c32_135 = arith.constant 32 : index
    %c0_136 = arith.constant 0 : index
    %303 = vector.load %arg6[%c1_134, %c32_135, %c0_136] : memref<2x33x128xf32, #tpu.memory_space<vmem>>, vector<1x1x128xf32>
    %304 = vector.shape_cast %303 : vector<1x1x128xf32> to vector<1x128xf32>
    %305 = vector.broadcast %304 : vector<1x128xf32> to vector<8x128xf32>
    %306 = arith.addf %302, %305 : vector<8x128xf32>
    %cst_137 = arith.constant 5.000000e-01 : f32
    %307 = vector.broadcast %cst_137 : f32 to vector<8x128xf32>
    %308 = arith.mulf %307, %306 : vector<8x128xf32>
    %cst_138 = arith.constant 4.471500e-02 : f32
    %309 = vector.broadcast %cst_138 : f32 to vector<8x128xf32>
    %310 = arith.mulf %309, %306 : vector<8x128xf32>
    %311 = arith.mulf %310, %306 : vector<8x128xf32>
    %312 = arith.mulf %311, %306 : vector<8x128xf32>
    %313 = arith.addf %306, %312 : vector<8x128xf32>
    %cst_139 = arith.constant 0.797884583 : f32
    %314 = vector.broadcast %cst_139 : f32 to vector<8x128xf32>
    %315 = arith.mulf %314, %313 : vector<8x128xf32>
    %316 = math.tanh %315 : vector<8x128xf32>
    %cst_140 = arith.constant 1.000000e+00 : f32
    %317 = vector.broadcast %cst_140 : f32 to vector<8x128xf32>
    %318 = arith.addf %317, %316 : vector<8x128xf32>
    %319 = arith.mulf %308, %318 : vector<8x128xf32>
    %c1_141 = arith.constant 1 : index
    %c0_142 = arith.constant 0 : index
    %c0_143 = arith.constant 0 : index
    %320 = vector.load %arg7[%c1_141, %c0_142, %c0_143] : memref<2x128x32xf32, #tpu.memory_space<vmem>>, vector<1x128x32xf32>
    %321 = vector.shape_cast %320 : vector<1x128x32xf32> to vector<128x32xf32>
    %cst_144 = arith.constant dense<0.000000e+00> : vector<8x32xf32>
    %322 = tpu.matmul %319, %321, %cst_144 {dimension_numbers = #tpu.dot_dimension_numbers<[1], [0], [0], [1], [0, 0, 1, 1], [], []>} : vector<8x128xf32>, vector<128x32xf32>, vector<8x32xf32> -> vector<8x32xf32>
    %c1_145 = arith.constant 1 : index
    %c6_146 = arith.constant 6 : index
    %c0_147 = arith.constant 0 : index
    %323 = vector.load %arg8[%c1_145, %c6_146, %c0_147] : memref<2x9x32xf32, #tpu.memory_space<vmem>>, vector<1x1x32xf32>
    %324 = vector.shape_cast %323 : vector<1x1x32xf32> to vector<1x32xf32>
    %325 = vector.broadcast %324 : vector<1x32xf32> to vector<8x32xf32>
    %326 = arith.addf %322, %325 : vector<8x32xf32>
    %327 = arith.addf %326, %299 : vector<8x32xf32>
    %c1_148 = arith.constant 1 : index
    %c7_149 = arith.constant 7 : index
    %c0_150 = arith.constant 0 : index
    %328 = vector.load %arg8[%c1_148, %c7_149, %c0_150] : memref<2x9x32xf32, #tpu.memory_space<vmem>>, vector<1x1x32xf32>
    %329 = vector.shape_cast %328 : vector<1x1x32xf32> to vector<1x32xf32>
    %c1_151 = arith.constant 1 : index
    %c8_152 = arith.constant 8 : index
    %c0_153 = arith.constant 0 : index
    %330 = vector.load %arg8[%c1_151, %c8_152, %c0_153] : memref<2x9x32xf32, #tpu.memory_space<vmem>>, vector<1x1x32xf32>
    %331 = vector.shape_cast %330 : vector<1x1x32xf32> to vector<1x32xf32>
    %cst_154 = arith.constant dense<0.000000e+00> : vector<8xf32>
    %332 = vector.multi_reduction <add>, %327, %cst_154 [1] : vector<8x32xf32> to vector<8xf32>
    %333 = vector.shape_cast %332 : vector<8xf32> to vector<8x1xf32>
    %cst_155 = arith.constant 3.200000e+01 : f32
    %334 = vector.broadcast %cst_155 : f32 to vector<8x1xf32>
    %335 = arith.divf %333, %334 : vector<8x1xf32>
    %336 = arith.mulf %327, %327 : vector<8x32xf32>
    %cst_156 = arith.constant dense<0.000000e+00> : vector<8xf32>
    %337 = vector.multi_reduction <add>, %336, %cst_156 [1] : vector<8x32xf32> to vector<8xf32>
    %338 = vector.shape_cast %337 : vector<8xf32> to vector<8x1xf32>
    %cst_157 = arith.constant 3.200000e+01 : f32
    %339 = vector.broadcast %cst_157 : f32 to vector<8x1xf32>
    %340 = arith.divf %338, %339 : vector<8x1xf32>
    %341 = arith.mulf %335, %335 : vector<8x1xf32>
    %342 = arith.subf %340, %341 : vector<8x1xf32>
    %cst_158 = arith.constant 0.000000e+00 : f32
    %343 = vector.broadcast %cst_158 : f32 to vector<8x1xf32>
    %344 = arith.maximumf %342, %343 : vector<8x1xf32>
    %345 = vector.broadcast %335 : vector<8x1xf32> to vector<8x32xf32>
    %346 = arith.subf %327, %345 : vector<8x32xf32>
    %cst_159 = arith.constant 9.99999996E-13 : f32
    %347 = vector.broadcast %cst_159 : f32 to vector<8x1xf32>
    %348 = arith.addf %344, %347 : vector<8x1xf32>
    %349 = math.rsqrt %348 : vector<8x1xf32>
    %350 = vector.broadcast %349 : vector<8x1xf32> to vector<8x32xf32>
    %351 = arith.mulf %346, %350 : vector<8x32xf32>
    %352 = vector.broadcast %329 : vector<1x32xf32> to vector<8x32xf32>
    %353 = arith.mulf %351, %352 : vector<8x32xf32>
    %354 = vector.broadcast %331 : vector<1x32xf32> to vector<8x32xf32>
    %355 = arith.addf %353, %354 : vector<8x32xf32>
    %356 = vector.shape_cast %355 : vector<8x32xf32> to vector<1x8x32xf32>
    %c0_160 = arith.constant 0 : index
    %c0_161 = arith.constant 0 : index
    %c0_162 = arith.constant 0 : index
    %357 = vector.load %arg9[%c0_160, %c0_161, %c0_162] : memref<1x8x32xf32, #tpu.memory_space<vmem>>, vector<1x8x32xf32>
    tpu.vector_store %arg9[%c0_160, %c0_161, %c0_162], %356 {strides = array<i32>} : memref<1x8x32xf32, #tpu.memory_space<vmem>>, vector<1x8x32xf32>,
    return
  }
  func.func @transform_0(%arg0: i32) -> (i32, i32, i32) {
    %c0_i32 = arith.constant 0 : i32
    %c0_i32_0 = arith.constant 0 : i32
    %c0_i32_1 = arith.constant 0 : i32
    return %arg0, %c0_i32, %c0_i32_0 : i32, i32, i32
  }
  func.func @transform_1(%arg0: i32) -> (i32, i32, i32) {
    %c0_i32 = arith.constant 0 : i32
    %c0_i32_0 = arith.constant 0 : i32
    %c0_i32_1 = arith.constant 0 : i32
    return %arg0, %c0_i32, %c0_i32_0 : i32, i32, i32
  }
  func.func @transform_2(%arg0: i32) -> (i32, i32, i32) {
    %c0_i32 = arith.constant 0 : i32
    %c0_i32_0 = arith.constant 0 : i32
    %c0_i32_1 = arith.constant 0 : i32
    return %arg0, %c0_i32, %c0_i32_0 : i32, i32, i32
  }
  func.func @transform_3(%arg0: i32) -> (i32, i32) {
    %c0_i32 = arith.constant 0 : i32
    %c0_i32_0 = arith.constant 0 : i32
    %c0_i32_1 = arith.constant 0 : i32
    return %c0_i32, %c0_i32_0 : i32, i32
  }
  func.func @transform_4(%arg0: i32) -> (i32, i32, i32) {
    %c0_i32 = arith.constant 0 : i32
    %c0_i32_0 = arith.constant 0 : i32
    %c0_i32_1 = arith.constant 0 : i32
    %c0_i32_2 = arith.constant 0 : i32
    return %c0_i32, %c0_i32_0, %c0_i32_1 : i32, i32, i32
  }
  func.func @transform_5(%arg0: i32) -> (i32, i32, i32) {
    %c0_i32 = arith.constant 0 : i32
    %c0_i32_0 = arith.constant 0 : i32
    %c0_i32_1 = arith.constant 0 : i32
    %c0_i32_2 = arith.constant 0 : i32
    return %c0_i32, %c0_i32_0, %c0_i32_1 : i32, i32, i32
  }
  func.func @transform_6(%arg0: i32) -> (i32, i32, i32) {
    %c0_i32 = arith.constant 0 : i32
    %c0_i32_0 = arith.constant 0 : i32
    %c0_i32_1 = arith.constant 0 : i32
    %c0_i32_2 = arith.constant 0 : i32
    return %c0_i32, %c0_i32_0, %c0_i32_1 : i32, i32, i32
  }
  func.func @transform_7(%arg0: i32) -> (i32, i32, i32) {
    %c0_i32 = arith.constant 0 : i32
    %c0_i32_0 = arith.constant 0 : i32
    %c0_i32_1 = arith.constant 0 : i32
    %c0_i32_2 = arith.constant 0 : i32
    return %c0_i32, %c0_i32_0, %c0_i32_1 : i32, i32, i32
  }
  func.func @transform_8(%arg0: i32) -> (i32, i32, i32) {
    %c0_i32 = arith.constant 0 : i32
    %c0_i32_0 = arith.constant 0 : i32
    %c0_i32_1 = arith.constant 0 : i32
    return %arg0, %c0_i32, %c0_i32_0 : i32, i32, i32
  }
}

</mosaic_0001>

<bundles_post_ra>
// kernel: tpu_custom_call.1
= control target key start
LH: loop header
LB: loop body
LE: loop exit
PB: predicated region body
PF: predicated region fallthrough
CT: control target
= control target key end

     0   :  { %13 = vsyncpa [#allocation3], 0  ;;  %s3346_s0 = inlined_call_operand.vmem [shape: f32[2,8,32], index: 0, kind: input, shape index: {}]   ;;  %s3347_s1 = inlined_call_operand.vmem [shape: f32[2,1,8], index: 1, kind: input, shape index: {}]   ;;  %s3348_s2 = inlined_call_operand.vmem [shape: f32[2,8,1], index: 2, kind: input, shape index: {}]   ;;  %s3349_s3 = inlined_call_operand.vmem [shape: f32[2,32], index: 3, kind: input, shape index: {}]   ;;  %s3350_s4 = inlined_call_operand.vmem [shape: f32[2,32,128], index: 4, kind: input, shape index: {}]   ;;  %s3351_s5 = inlined_call_operand.vmem [shape: f32[2,33,128], index: 5, kind: input, shape index: {}]   ;;  %s3352_s6 = inlined_call_operand.vmem [shape: f32[2,128,32], index: 6, kind: input, shape index: {}]   ;;  %s3353_s7 = inlined_call_operand.vmem [shape: f32[2,9,32], index: 7, kind: input, shape index: {}]   ;;  %s3354_s8 = inlined_call_operand.hbm [shape: f32[2,8,32], index: 8, kind: output, shape index: {}]  }
   0x1   :  { %15 = vsyncpa [#allocation3 + $0x1], 0  ;;  %s2850_s27 = smov 0   ;;  %s2852_s28 = smov 0  }
   0x2   :  { %s2854_s29 = smov 0   ;;  %s2856_s30 = smov 0  }
   0x3 LB: > { %s2871_s9 = sadd.s32 4294967295, %s2792_s30   ;;  %s2188_s10 = sadd.s32 4294967294, %s2792_s30   ;;  %s2792_s30 = sphi %s2856_s30, %s3364_s30   ;;  %s2788_s29 = sphi %s2854_s29, %s3363_s29   ;;  %s2784_s28 = sphi %s2852_s28, %s3362_s28   ;;  %s2780_s27 = sphi %s2850_s27, %s3361_s27  }
   0x4   : > { %s2875_s11 = sadd.s32 1, %s2792_s30   ;;  %s211_s12 = sadd.s32 1, %s2788_s29 }
   0x5   : > { %s208_s13 = ssub.s32 %s2792_s30, %s2875_s11  ;;  %p221_p0 = scmp.ne.s32.totalorder %s2788_s29, %s2784_s28 }
   0x6   : > { %p209_p1 = scmp.eq.s32.totalorder %s208_s13, 0  ;;  %p222_p2 = scmp.eq.s32.totalorder %s2871_s9, 1 }
   0x7   : > { %p227_p3 = scmp.ne.s32.totalorder %s2784_s28, %s2780_s27  ;;  %p228_p4 = scmp.eq.s32.totalorder %s2188_s10, 1 }
   0x8   : > { %s2886_s14 = scalar_select %p209_p1, %s2788_s29, %s211_s12  }
   0x9   : > { %p2888_p5 = por %p222_p2, %p221_p0  ;;  %p2892_p6 = por %p228_p4, %p227_p3 }
   0xa   : > { %p2191_p7 = scmp.ge.s32.totalorder %s2792_s30, 1  ;;  %p281_p8 = scmp.lt.s32.totalorder %s2792_s30, 3 }
   0xc   : > { %p282_p9 = pnand %p2191_p7, %p281_p8 }
   0xd   : > { %p321_p10 = scmp.lt.s32.totalorder (!%p282_p9), %s2871_s9, 1  ;;  %v2794_v0 = vmov (!%p282_p9), 0   ;;  %vm352_vm0 = vcmask (!%p282_p9), 261120   ;;  %v2914_v6 = vld [vmem:[%s3350_s4] sm:$0xff] (!%p282_p9)  ;;  %v2919_v7 = vld [vmem:[%s3350_s4 + $0x8] sm:$0xff] (!%p282_p9)  ;;  %v2924_v8 = vld [vmem:[%s3350_s4 + $0x10] sm:$0xff] (!%p282_p9)  ;;  %v333_v40 = vlaneseq (!%p282_p9) }
   0xe   : > { %285 = sbr.rel (%p282_p9) target bundleno = 5458 (0x1552), region = 52  ;;  %2678 = vset.pattern.permute.xlu1 (!%p282_p9), %v2794_v0  ;;  %2699 = vset.pattern.permute.xlu0 (!%p282_p9), %v2794_v0  ;;  %v2795_v9 = vmov (!%p282_p9), 0.0|0.0   ;;  %v2546_v10 = vpack.c.bf16 (!%p282_p9), %v2919_v7, %v2914_v6  ;;  %v2932_v11 = vld [vmem:[%s3350_s4 + $0x18] sm:$0xff] (!%p282_p9)  ;;  %v2796_v13 = vmov (!%p282_p9), 0.0   ;;  %vm2797_vm1 = vmmov (!%p282_p9), 0   ;;  %s2798_s23 = smov (!%p282_p9), 32  }
   0xf   : > { %2545 = vmatprep.subr.bf16.mxu0 (!%p282_p9), %v2795_v9  ;;  %2554 = vmatprep.subr.bf16.mxu1 (!%p282_p9), %v2795_v9  ;;  %v2549_v12 = vpack.c.bf16 (!%p282_p9), %v2932_v11, %v2924_v8  ;;  %v2201_v14 = vld [vmem:[%s3353_s7 + $0x1] ss:$0 sm:$0xff] (!%p282_p9)  ;;  %v2197_v25 = vld [vmem:[%s3349_s3] ss:$0 sm:$0xff] (!%p282_p9)  ;;  %s2799_s12 = smov (!%p282_p9), 96   ;;  %s2800_s19 = smov (!%p282_p9), 64  }
  0x10   : > { %2547 = vmatpush3.bf16.msra.mxu0 (!%p282_p9), %v2546_v10  ;;  %2371 = vmatprep.mubr.msk.f32.mxu0 (!%p282_p9), %vm2797_vm1, %v2796_v13  ;;  %v2198_v27 = vld [vmem:[%s3349_s3 + $0x1] ss:$0 sm:$0xff] (!%p282_p9)  ;;  %v2202_v36 = vld [vmem:[%s3353_s7 + $0x2] ss:$0 sm:$0xff] (!%p282_p9)  ;;  %vm493_vm2 = vcmask (!%p282_p9), 130048   ;;  %v334_v41 = vshrl.u32 (!%p282_p9), %v333_v40, 7 }
  0x11   : > { %2548 = vmatprep.subr.bf16.mxu0 (!%p282_p9), %v2795_v9  ;;  %2405 = vmatprep.mubr.msk.f32.mxu1 (!%p282_p9), %vm2797_vm1, %v2796_v13  ;;  %v2200_v37 = vld [vmem:[%s3353_s7] ss:$0 sm:$0xff] (!%p282_p9)  ;;  %v336_v42 = vand.u32 (!%p282_p9), 127, %v333_v40  ;;  %vm571_vm4 = vcmask (!%p282_p9), 64512   ;;  %s2802_s26 = smov (!%p282_p9), 112   ;;  %s3355_s10 = smov (!%p282_p9), 48  }
  0x13   : > { %vm337_vm3 = vcmp.le.s32.totalorder (!%p282_p9), %v336_v42, %v334_v41 }
  0x14   : > { %2550 = vmatpush3.bf16.msra.mxu0 (!%p282_p9), %v2549_v12  ;;  %v2195_v44 = vsel (!%p282_p9), %vm337_vm3, 1.0, %v2796_v13 }
  0x15   : > { %s2900_s17 = scalar_select %p321_p10, %s2871_s9, 1  ;;  %2374 = vmatprep.subr.mxu0 %v2796_v13 }
  0x17   : > { %s2193_s18 = sshll.u32 %s2900_s17, 3  ;;  %s327_s25 = scalar_lea.vmem %s3347_s1, %s2900_s17 }
  0x18   : > { %s324_s21 = scalar_lea.vmem %s3346_s0, %s2193_s18  ;;  %s331_s24 = scalar_lea.vmem %s3348_s2, %s2193_s18  ;;  %v2196_v43 = vld [vmem:[%s327_s25] ss:$0 sm:$0xff] }
  0x19   : > { %v349_v1 = vld [vmem:[%s324_s21] sm:$0xff]  ;;  %v346_v45 = vmul.f32 %v2196_v43, %v2195_v44  ;;  %s3356_s17 = smov 80   ;;  %s2278_s18 = sshll.u32 %s2871_s9, 7 }
  0x1a   : > { %v380_v2 = vld [vmem:[%s331_s24] sm:$0xff]  ;;  %v353_v3 = vsel %vm352_vm0, %v349_v1, 0.0  ;;  %v358_v4 = vmul.f32 %v349_v1, %v349_v1  ;;  %s3303_s24 = scalar_lea.hbm %s3354_s8, %s2278_s18  ;;  %s2804_s9 = smov [#allocation2]  }
  0x1b   : > { %383 = vperm.xlu1 %2678, %v380_v2   ;;  %354 = vadd.xlane.f32.xlu0 %v353_v3  ;;  %v347_v46 = vsub.f32 1.0, %v346_v45  ;;  %v1028_v44 = vld [vmem:[%s3351_s5] sm:$0xff]  ;;  %v1029_v45 = vld [vmem:[%s3351_s5 + $0x8] sm:$0xff] }
  0x1c   : > { %v359_v5 = vsel %vm352_vm0, %v358_v4, 0.0 }
  0x1d   : > { %v2977_v47 = vmul.f32 -10000.0, %v347_v46  ;;  %v2558_v46 = vpack.c.bf16 %v1029_v45, %v1028_v44 }
  0x1f   : > { %360 = vadd.xlane.f32.xlu0 %v359_v5  ;;  %476 = vrot.lane.b32.xlu1 %v2201_v14, %s2798_s23 }
  0x9a   : > { %v384_v29 = vpop.permute.xlu1 %383 }
  0x9e   : > { %v477_v32 = vpop.permute.xlu1 %476 }
  0xa8   : > { %v355_v15 = vpop.xlane.xlu0 %354 }
  0xa9   : > { %v357_v16 = vmul.f32 0.03125, %v355_v15  ;;  %v2684_v15 = vpack.i.bf16 %v2919_v7, %v2914_v6  ;;  %v2679_v7 = vpack.i.bf16 %v2932_v11, %v2924_v8 }
  0xab   : > { %v363_v18 = vmul.f32 %v357_v16, %v357_v16  ;;  %v366_v23 = vsub.f32 %v349_v1, %v357_v16 }
  0xac   : > { %v361_v17 = vpop.xlane.xlu0 %360 }
  0xad   : > { %v362_v19 = vmul.f32 0.03125, %v361_v17 }
  0xaf   : > { %v364_v20 = vsub.f32 %v362_v19, %v363_v18 }
  0xb1   : > { %v365_v21 = vmax.f32 %v364_v20, 0.0 }
  0xb3   : > { %v367_v22 = vadd.f32 1e-12, %v365_v21 }
  0xb5   : > { %2700 = vrsqrt.f32 %v367_v22 }
  0xbf   : > { %v2701_v24 = vpop.eup %2700 }
  0xc0   : > { %v369_v26 = vmul.f32 %v2701_v24, %v366_v23 }
  0xc2   : > { %v374_v28 = vmul.f32 %v2197_v25, %v369_v26 }
  0xc4   : > { %v379_v30 = vadd.f32 %v2198_v27, %v374_v28 }
  0xc6   : > { %v2953_v31 = vmul.f32 %v384_v29, %v379_v30 }
  0xc8   : > { %2372 = vmatmul.mubr.msk.f32.vlgmr.msra.gmra.mrb[0].mxu0 %vm352_vm0, %v2953_v31 }
  0xc9   : > { %2376 = vmatprep.mubr.msk.f32.mxu0 %vm2797_vm1, %v2796_v13 }
 0x19b   : > { %v460_v33 = vpop.f32.mrb[0].mxu0 }
 0x19c   : > { %v479_v34 = vadd.f32 %v477_v32, %v460_v33  ;;  %v2373_v35 = vpop.f32.mrb[1].mxu0  ;;  %v469_v39 = vadd.f32 %v2200_v37, %v460_v33 }
 0x19e   : > { %491 = vrot.lane.b32.xlu0 %v479_v34, %s2799_s12 }
 0x1a2   : > { %486 = vrot.lane.b32.xlu0 %v2202_v36, %s2800_s19  ;;  %v2211_v36 = vld [vmem:[%s3353_s7 + $0x3] ss:$0 sm:$0xff] }
 0x210   : > { %v492_v38 = vpop.permute.xlu0 %491 }
 0x211   : > { %2375 = vmatpush3.xpose.msk.msra.mxu0 %vm493_vm2, %v492_v38 }
 0x212   : > { %2379 = vmatprep.subr.mxu0 %v2796_v13 }
 0x214   : > { %2377 = vmatmul.mubr.msk.f32.vlgmr.msra.gmra.mrb[2].mxu0 %vm493_vm2, %v469_v39  ;;  %v487_v53 = vpop.permute.xlu0 %486 }
 0x215   : > { %2381 = vmatprep.mubr.msk.f32.mxu0 %vm2797_vm1, %v2796_v13  ;;  %v489_v54 = vadd.f32 %v487_v53, %v460_v33 }
 0x2e7   : > { %v565_v48 = vpop.f32.mrb[2].mxu0 }
 0x2e8   : > { %v569_v49 = vmul.f32 0.25, %v565_v48  ;;  %v2378_v50 = vpop.f32.mrb[3].mxu0  ;;  %v1031_v48 = vld [vmem:[%s3351_s5 + $0x18] sm:$0xff] }
 0x2e9   : > { %v1119_v50 = vld [vmem:[%s3352_s6] sm:$0xff] }
 0x2ea   : > { %v570_v51 = vadd.f32 %v569_v49, %v2977_v47 }
 0x2ec   : > { %v572_v52 = vsel %vm571_vm4, %v570_v51, -inf }
 0x2ed   : > { %573 = vmax.xlane.f32.xlu1 %v572_v52 }
 0x2fe   : > { %584 = vrot.lane.b32.xlu1 %v489_v54, %s2800_s19 }
 0x302   : > { %664 = vrot.lane.b32.xlu1 %v479_v34, %s3356_s17 }
 0x37a   : > { %v574_v55 = vpop.xlane.xlu1 %573 }
 0x37b   : > { %v575_v56 = vsub.f32 %v570_v51, %v574_v55  ;;  %v1120_v51 = vld [vmem:[%s3352_s6 + $0x8] sm:$0xff] }
 0x37c   : > { %v2564_v52 = vpack.c.bf16 %v1120_v51, %v1119_v50  ;;  %v3119_v50 = vld [vmem:[%s3350_s4 + $0x28] sm:$0xff] }
 0x37d   : > { %v576_v57 = vmul.f32 1.442695, %v575_v56 }
 0x37e   : > { %v585_v58 = vpop.permute.xlu1 %584 }
 0x37f   : > { %2702 = vpow2.f32 %v576_v57  ;;  %2380 = vmatpush3.msra.mxu0 %v585_v58 }
 0x380   : > { %2384 = vmatprep.subr.mxu0 %v2796_v13 }
 0x382   : > { %v665_v0 = vpop.permute.xlu1 %664 }
 0x389   : > { %v2703_v59 = vpop.eup %2702 }
 0x38a   : > { %v578_v60 = vsel %vm571_vm4, %v2703_v59, 0.0 }
 0x38b   : > { %579 = vadd.xlane.f32.xlu0 %v578_v60 }
 0x3a1   : > { %662 = vrot.lane.b32.xlu0 %v469_v39, %s2802_s26 }
 0x418   : > { %v580_v61 = vpop.xlane.xlu0 %579 }
 0x419   : > { %2704 = vrcp.f32 %v580_v61 }
 0x41c   : > { %v663_v1 = vpop.permute.xlu0 %662 }
 0x423   : > { %v2705_v62 = vpop.eup %2704 }
 0x424   : > { %v582_v63 = vmul.f32 %v2705_v62, %v2703_v59 }
 0x426   : > { %2382 = vmatmul.mubr.msk.f32.vlgmr.msra.gmra.mrb[4].mxu0 %vm571_vm4, %v582_v63  ;;  %v2212_v63 = vld [vmem:[%s3353_s7 + $0x4] ss:$0 sm:$0xff] }
 0x427   : > { %2385 = vmatpush3.xpose.msk.msra.mxu0 %vm493_vm2, %v665_v0  ;;  %2386 = vmatprep.mubr.msk.f32.mxu0 %vm2797_vm1, %v2796_v13 }
 0x428   : > { %2389 = vmatprep.subr.mxu0 %v2796_v13 }
 0x42a   : > { %2387 = vmatmul.mubr.msk.f32.vlgmr.msra.gmra.mrb[6].mxu0 %vm493_vm2, %v663_v1  ;;  %v2213_v1 = vld [vmem:[%s3353_s7 + $0x5] ss:$0 sm:$0xff] }
 0x42b   : > { %2391 = vmatprep.mubr.msk.f32.mxu0 %vm2797_vm1, %v2796_v13 }
 0x4f9   : > { %v656_v2 = vpop.f32.mrb[4].mxu0 }
 0x4fa   : > { %v2383_v3 = vpop.f32.mrb[5].mxu0 }
 0x4fd   : > { %v736_v4 = vpop.f32.mrb[6].mxu0 }
 0x4fe   : > { %v740_v5 = vmul.f32 0.25, %v736_v4  ;;  %v2388_v10 = vpop.f32.mrb[7].mxu0  ;;  %v1121_v4 = vld [vmem:[%s3352_s6 + $0x10] sm:$0xff] }
 0x500   : > { %v741_v12 = vadd.f32 %v740_v5, %v2977_v47  ;;  %v1122_v5 = vld [vmem:[%s3352_s6 + $0x18] sm:$0xff] }
 0x501   : > { %v2567_v10 = vpack.c.bf16 %v1122_v5, %v1121_v4  ;;  %v2218_v4 = vld [vmem:[%s3353_s7 + $0x8] ss:$0 sm:$0xff] }
 0x502   : > { %v742_v14 = vsel %vm571_vm4, %v741_v12, -inf }
 0x503   : > { %743 = vmax.xlane.f32.xlu1 %v742_v14  ;;  %v1124_v14 = vld [vmem:[%s3352_s6 + $0x28] sm:$0xff] }
 0x514   : > { %753 = vrot.lane.b32.xlu1 %v489_v54, %s3355_s10 }
 0x518   : > { %2685 = vrot.lane.b32.xlu1 %v2684_v15, %s2798_s23 }
 0x590   : > { %v744_v16 = vpop.xlane.xlu1 %743 }
 0x591   : > { %v745_v17 = vsub.f32 %v741_v12, %v744_v16  ;;  %v1123_v12 = vld [vmem:[%s3352_s6 + $0x20] sm:$0xff]  ;;  %v1125_v16 = vld [vmem:[%s3352_s6 + $0x30] sm:$0xff] }
 0x592   : > { %v2570_v15 = vpack.c.bf16 %v1124_v14, %v1123_v12 }
 0x593   : > { %v746_v18 = vmul.f32 1.442695, %v745_v17  ;;  %v1126_v17 = vld [vmem:[%s3352_s6 + $0x38] sm:$0xff] }
 0x594   : > { %v754_v19 = vpop.permute.xlu1 %753 }
 0x595   : > { %2706 = vpow2.f32 %v746_v18  ;;  %2390 = vmatpush3.msra.mxu0 %v754_v19  ;;  %v2573_v18 = vpack.c.bf16 %v1126_v17, %v1125_v16  ;;  %v1127_v19 = vld [vmem:[%s3352_s6 + $0x40] sm:$0xff]  ;;  %v2229_v17 = vld [vmem:[%s3353_s7 + $0x12] ss:$0 sm:$0xff] }
 0x596   : > { %2551 = vmatprep.subr.bf16.mxu0 %v2795_v9 }
 0x598   : > { %v2686_v20 = vpop.permute.xlu1 %2685 }
 0x599   : > { %v2688_v21 = vunpack.i.h.bf16 %v2686_v20  ;;  %v2687_v22 = vunpack.i.l.bf16 %v2686_v20  ;;  %v1128_v20 = vld [vmem:[%s3352_s6 + $0x48] sm:$0xff] }
 0x59b   : > { %v2555_v23 = vpack.c.bf16 %v2688_v21, %v2687_v22  ;;  %v2576_v21 = vpack.c.bf16 %v1128_v20, %v1127_v19  ;;  %v1129_v22 = vld [vmem:[%s3352_s6 + $0x50] sm:$0xff] }
 0x59d   : > { %2556 = vmatpush3.bf16.msra.mxu1 %v2555_v23  ;;  %v1130_v23 = vld [vmem:[%s3352_s6 + $0x58] sm:$0xff] }
 0x59e   : > { %2563 = vmatprep.subr.bf16.mxu1 %v2795_v9 }
 0x59f   : > { %v2707_v24 = vpop.eup %2706 }
 0x5a0   : > { %2406 = vmatmul.mubr.msk.f32.vlgmr.msra.gmra.mrb[0].mxu1 %vm493_vm2, %v656_v2  ;;  %v748_v6 = vsel %vm571_vm4, %v2707_v24, 0.0 }
 0x5a1   : > { %749 = vadd.xlane.f32.xlu0 %v748_v6  ;;  %2451 = vmatprep.mubr.msk.f32.mxu1 %vm2797_vm1, %v2796_v13  ;;  %v1131_v6 = vld [vmem:[%s3352_s6 + $0x60] sm:$0xff] }
 0x5a2   : > { %2565 = vmatpush3.bf16.msra.mxu1 %v2564_v52  ;;  %v3126_v52 = vld [vmem:[%s3350_s4 + $0x30] sm:$0xff] }
 0x5a3   : > { %2566 = vmatprep.subr.bf16.mxu1 %v2795_v9 }
 0x5a6   : > { %2568 = vmatpush3.bf16.msra.mxu1 %v2567_v10 }
 0x5a7   : > { %2569 = vmatprep.subr.bf16.mxu1 %v2795_v9 }
 0x5aa   : > { %2571 = vmatpush3.bf16.msra.mxu1 %v2570_v15 }
 0x5ab   : > { %2572 = vmatprep.subr.bf16.mxu1 %v2795_v9 }
 0x5ae   : > { %2574 = vmatpush3.bf16.msra.mxu1 %v2573_v18  ;;  %v2225_v18 = vld [vmem:[%s3353_s7 + $0x10] ss:$0 sm:$0xff] }
 0x5af   : > { %2575 = vmatprep.subr.bf16.mxu1 %v2795_v9 }
 0x5b2   : > { %2577 = vmatpush3.bf16.msra.mxu1 %v2576_v21 }
 0x5b3   : > { %2578 = vmatprep.subr.bf16.mxu1 %v2795_v9 }
 0x5b7   : > { %2680 = vrot.lane.b32.xlu0 %v2679_v7, %s2798_s23  ;;  %v1132_v7 = vld [vmem:[%s3352_s6 + $0x68] sm:$0xff] }
 0x62e   : > { %v750_v25 = vpop.xlane.xlu0 %749 }
 0x62f   : > { %2708 = vrcp.f32 %v750_v25  ;;  %v2582_v25 = vpack.c.bf16 %v1132_v7, %v1131_v6 }
 0x632   : > { %v2681_v28 = vpop.permute.xlu0 %2680 }
 0x633   : > { %v2683_v29 = vunpack.i.h.bf16 %v2681_v28  ;;  %v2682_v30 = vunpack.i.l.bf16 %v2681_v28 }
 0x635   : > { %v2552_v32 = vpack.c.bf16 %v2683_v29, %v2682_v30  ;;  %v2214_v29 = vld [vmem:[%s3351_s5 + $0x20] ss:$0 sm:$0xff] }
 0x639   : > { %v2709_v26 = vpop.eup %2708 }
 0x63a   : > { %v752_v27 = vmul.f32 %v2709_v26, %v2707_v24  ;;  %v2579_v24 = vpack.c.bf16 %v1130_v23, %v1129_v22  ;;  %v1133_v26 = vld [vmem:[%s3352_s6 + $0x70] sm:$0xff] }
 0x63c   : > { %2392 = vmatmul.mubr.msk.f32.vlgmr.msra.gmra.mrb[8].mxu0 %vm571_vm4, %v752_v27  ;;  %2580 = vmatpush3.bf16.msra.mxu1 %v2579_v24  ;;  %v1134_v27 = vld [vmem:[%s3352_s6 + $0x78] sm:$0xff] }
 0x63d   : > { %2398 = vmatprep.mubr.msk.f32.mxu0 %vm2797_vm1, %v2796_v13  ;;  %2553 = vmatpush3.bf16.msra.mxu0 %v2552_v32  ;;  %v2585_v28 = vpack.c.bf16 %v1134_v27, %v1133_v26 }
 0x63e   : > { %2557 = vmatprep.subr.bf16.mxu0 %v2795_v9  ;;  %2581 = vmatprep.subr.bf16.mxu1 %v2795_v9 }
 0x640   : > { %2583 = vmatpush3.bf16.msra.mxu1 %v2582_v25 }
 0x641   : > { %2584 = vmatprep.subr.bf16.mxu1 %v2795_v9 }
 0x644   : > { %2586 = vmatpush3.bf16.msra.mxu1 %v2585_v28 }
 0x645   : > { %2596 = vmatprep.subr.bf16.mxu1 %v2795_v9 }
 0x673   : > { %v989_v33 = vpop.f32.mrb[0].mxu1 }
 0x674   : > { %v2407_v8 = vpop.f32.mrb[1].mxu1 }
 0x70f   : > { %v825_v11 = vpop.f32.mrb[8].mxu0 }
 0x710   : > { %v2393_v34 = vpop.f32.mrb[9].mxu0  ;;  %2399 = vmatmul.mubr.msk.f32.vlgmr.msra.gmra.mrb[10].mxu0 %vm493_vm2, %v825_v11 }
 0x711   : > { %2416 = vmatprep.mubr.msk.f32.mxu0 %vm2797_vm1, %v2796_v13  ;;  %2559 = vmatpush3.bf16.msra.mxu0 %v2558_v46 }
 0x712   : > { %2560 = vmatprep.subr.bf16.mxu0 %v2795_v9 }
 0x7e3   : > { %v908_v35 = vpop.f32.mrb[10].mxu0 }
 0x7e4   : > { %v990_v37 = vadd.f32 %v989_v33, %v908_v35  ;;  %v2400_v38 = vpop.f32.mrb[11].mxu0 }
 0x7e6   : > { %v998_v39 = vadd.f32 %v2211_v36, %v990_v37 }
 0x7e8   : > { %v999_v40 = vadd.f32 %v998_v39, %v2953_v31  ;;  %v1030_v31 = vld [vmem:[%s3351_s5 + $0x10] sm:$0xff] }
 0x7e9   : > { %v2561_v49 = vpack.c.bf16 %v1031_v48, %v1030_v31 }
 0x7ea   : > { %v1002_v41 = vsel %vm352_vm0, %v999_v40, 0.0  ;;  %v1006_v42 = vmul.f32 %v999_v40, %v999_v40 }
 0x7eb   : > { %1003 = vadd.xlane.f32.xlu1 %v1002_v41  ;;  %2562 = vmatpush3.bf16.msra.mxu0 %v2561_v49  ;;  %v2216_v41 = vld [vmem:[%s3353_s7 + $0x6] ss:$0 sm:$0xff] }
 0x7ec   : > { %v1007_v43 = vsel %vm352_vm0, %v1006_v42, 0.0  ;;  %2587 = vmatprep.subr.bf16.mxu0 %v2795_v9  ;;  %v3114_v49 = vld [vmem:[%s3350_s4 + $0x20] sm:$0xff] }
 0x7ed   : > { %1008 = vadd.xlane.f32.xlu0 %v1007_v43  ;;  %v2588_v51 = vpack.c.bf16 %v3119_v50, %v3114_v49 }
 0x878   : > { %v1004_v53 = vpop.xlane.xlu1 %1003 }
 0x879   : > { %v1005_v54 = vmul.f32 0.03125, %v1004_v53  ;;  %v3131_v53 = vld [vmem:[%s3350_s4 + $0x38] sm:$0xff] }
 0x87a   : > { %v1009_v55 = vpop.xlane.xlu0 %1008 }
 0x87b   : > { %v1011_v56 = vmul.f32 %v1005_v54, %v1005_v54  ;;  %v1010_v57 = vmul.f32 0.03125, %v1009_v55  ;;  %v1014_v61 = vsub.f32 %v999_v40, %v1005_v54  ;;  %v2591_v54 = vpack.c.bf16 %v3131_v53, %v3126_v52  ;;  %v2227_v55 = vld [vmem:[%s3353_s7 + $0x11] ss:$0 sm:$0xff] }
 0x87d   : > { %v1012_v58 = vsub.f32 %v1010_v57, %v1011_v56 }
 0x87f   : > { %v1013_v59 = vmax.f32 %v1012_v58, 0.0 }
 0x881   : > { %v1015_v60 = vadd.f32 1e-12, %v1013_v59 }
 0x883   : > { %2710 = vrsqrt.f32 %v1015_v60 }
 0x88d   : > { %v2711_v62 = vpop.eup %2710 }
 0x88e   : > { %v1017_v0 = vmul.f32 %v2711_v62, %v1014_v61 }
 0x890   : > { %v1022_v2 = vmul.f32 %v2212_v63, %v1017_v0 }
 0x892   : > { %v1027_v3 = vadd.f32 %v2213_v1, %v1022_v2  ;;  %v2217_v2 = vld [vmem:[%s3353_s7 + $0x7] ss:$0 sm:$0xff] }
 0x894   : > { %2417 = vmatmul.mubr.msk.f32.vlgmr.msra.gmra.mrb[12].mxu0 %vm352_vm0, %v1027_v3 }
 0x895   : > { %2462 = vmatprep.mubr.msk.f32.mxu0 %vm2797_vm1, %v2796_v13  ;;  %2589 = vmatpush3.bf16.msra.mxu0 %v2588_v51 }
 0x896   : > { %2590 = vmatprep.subr.bf16.mxu0 %v2795_v9 }
 0x899   : > { %2592 = vmatpush3.bf16.msra.mxu0 %v2591_v54 }
 0x89a   : > { %2465 = vmatprep.subr.mxu0 %v2796_v13 }
 0x967   : > { %v1106_v30 = vpop.f32.mrb[12].mxu0 }
 0x968   : > { %v1107_v32 = vadd.f32 %v2214_v29, %v1106_v30  ;;  %v2418_v33 = vpop.f32.mrb[13].mxu0 }
 0x96a   : > { %v1111_v8 = vmul.f32 0.044715, %v1107_v32  ;;  %v1110_v38 = vmul.f32 0.5, %v1107_v32 }
 0x96c   : > { %v1112_v11 = vmul.f32 %v1111_v8, %v1107_v32 }
 0x96e   : > { %v1113_v34 = vmul.f32 %v1112_v11, %v1107_v32 }
 0x970   : > { %v1114_v35 = vadd.f32 %v1113_v34, %v1107_v32 }
 0x972   : > { %v1115_v36 = vmul.f32 0.7978846, %v1114_v35 }
 0x974   : > { %2712 = vtanh.f32 %v1115_v36 }
 0x97e   : > { %v2713_v37 = vpop.eup %2712 }
 0x97f   : > { %v1117_v39 = vadd.f32 1.0, %v2713_v37 }
 0x981   : > { %v1118_v40 = vmul.f32 %v1117_v39, %v1110_v38 }
 0x983   : > { %2452 = vmatmul.mubr.f32.vlgmr.msra.gmra.mrb[2].mxu1 %v1118_v40 }
 0x984   : > { %2496 = vmatprep.mubr.msk.f32.mxu1 %vm2797_vm1, %v2796_v13 }
 0xa56   : > { %v1206_v42 = vpop.f32.mrb[2].mxu1 }
 0xa57   : > { %v1207_v43 = vadd.f32 %v2216_v41, %v1206_v42  ;;  %v2453_v44 = vpop.f32.mrb[3].mxu1 }
 0xa59   : > { %v1210_v45 = vadd.f32 %v1207_v43, %v1027_v3  ;;  %v2694_v43 = vpack.i.bf16 %v3119_v50, %v3114_v49  ;;  %v2689_v50 = vpack.i.bf16 %v3131_v53, %v3126_v52 }
 0xa5b   : > { %v1213_v46 = vsel %vm352_vm0, %v1210_v45, 0.0  ;;  %v1217_v31 = vmul.f32 %v1210_v45, %v1210_v45 }
 0xa5c   : > { %1214 = vadd.xlane.f32.xlu1 %v1213_v46 }
 0xa5d   : > { %v1218_v48 = vsel %vm352_vm0, %v1217_v31, 0.0 }
 0xa60   : > { %1219 = vadd.xlane.f32.xlu1 %v1218_v48 }
 0xa71   : > { %1330 = vrot.lane.b32.xlu1 %v2227_v55, %s2798_s23 }
 0xae9   : > { %v1215_v56 = vpop.xlane.xlu1 %1214 }
 0xaea   : > { %v1216_v57 = vmul.f32 0.03125, %v1215_v56 }
 0xaec   : > { %v1222_v59 = vmul.f32 %v1216_v57, %v1216_v57  ;;  %v1225_v0 = vsub.f32 %v1210_v45, %v1216_v57 }
 0xaed   : > { %v1220_v58 = vpop.xlane.xlu1 %1219 }
 0xaee   : > { %v1221_v60 = vmul.f32 0.03125, %v1220_v58 }
 0xaf0   : > { %v1223_v61 = vsub.f32 %v1221_v60, %v1222_v59 }
 0xaf1   : > { %v1331_v12 = vpop.permute.xlu1 %1330 }
 0xaf2   : > { %v1224_v62 = vmax.f32 %v1223_v61, 0.0 }
 0xaf4   : > { %v1226_v63 = vadd.f32 1e-12, %v1224_v62 }
 0xaf6   : > { %2714 = vrsqrt.f32 %v1226_v63 }
 0xb00   : > { %v2715_v1 = vpop.eup %2714 }
 0xb01   : > { %v1228_v3 = vmul.f32 %v2715_v1, %v1225_v0 }
 0xb03   : > { %v1233_v5 = vmul.f32 %v2217_v2, %v1228_v3  ;;  %v2243_v2 = vld [vmem:[%s3353_s7 + $0x13] ss:$0 sm:$0xff] }
 0xb05   : > { %v3147_v10 = vadd.f32 %v2218_v4, %v1233_v5 }
 0xb07   : > { %2463 = vmatmul.mubr.msk.f32.vlgmr.msra.gmra.mrb[14].mxu0 %vm352_vm0, %v3147_v10 }
 0xb08   : > { %2467 = vmatprep.mubr.msk.f32.mxu0 %vm2797_vm1, %v2796_v13 }
 0xbda   : > { %v1313_v14 = vpop.f32.mrb[14].mxu0 }
 0xbdb   : > { %v1333_v15 = vadd.f32 %v1331_v12, %v1313_v14  ;;  %v2464_v16 = vpop.f32.mrb[15].mxu0  ;;  %v1323_v20 = vadd.f32 %v2225_v18, %v1313_v14 }
 0xbdd   : > { %1345 = vrot.lane.b32.xlu0 %v1333_v15, %s2799_s12  ;;  %s3359_s12 = smov 80  }
 0xbe1   : > { %1340 = vrot.lane.b32.xlu0 %v2229_v17, %s2800_s19  ;;  %v2249_v17 = vld [vmem:[%s3351_s5 + $0x30] sm:$0xff] }
 0xc4f   : > { %v1346_v19 = vpop.permute.xlu0 %1345 }
 0xc50   : > { %2466 = vmatpush3.xpose.msk.msra.mxu0 %vm493_vm2, %v1346_v19  ;;  %v2251_v19 = vld [vmem:[%s3351_s5 + $0x40] sm:$0xff] }
 0xc51   : > { %2470 = vmatprep.subr.mxu0 %v2796_v13 }
 0xc53   : > { %2468 = vmatmul.mubr.msk.f32.vlgmr.msra.gmra.mrb[16].mxu0 %vm493_vm2, %v1323_v20  ;;  %v1341_v7 = vpop.permute.xlu0 %1340 }
 0xc54   : > { %2472 = vmatprep.mubr.msk.f32.mxu0 %vm2797_vm1, %v2796_v13  ;;  %v1343_v25 = vadd.f32 %v1341_v7, %v1313_v14 }
 0xd26   : > { %v1418_v21 = vpop.f32.mrb[16].mxu0 }
 0xd27   : > { %v1422_v22 = vmul.f32 0.25, %v1418_v21  ;;  %v2469_v23 = vpop.f32.mrb[17].mxu0  ;;  %v2255_v21 = vld [vmem:[%s3352_s6 + $0x80] sm:$0xff] }
 0xd29   : > { %v1423_v24 = vadd.f32 %v1422_v22, %v2977_v47  ;;  %v2256_v22 = vld [vmem:[%s3352_s6 + $0x88] sm:$0xff] }
 0xd2a   : > { %v2606_v23 = vpack.c.bf16 %v2256_v22, %v2255_v21 }
 0xd2b   : > { %v1424_v6 = vsel %vm571_vm4, %v1423_v24, -inf }
 0xd2c   : > { %1425 = vmax.xlane.f32.xlu1 %v1424_v6 }
 0xd3d   : > { %1436 = vrot.lane.b32.xlu1 %v1343_v25, %s2800_s19  ;;  %s3360_s19 = smov 48  }
 0xd41   : > { %1514 = vrot.lane.b32.xlu1 %v1323_v20, %s2802_s26 }
 0xdb9   : > { %v1426_v26 = vpop.xlane.xlu1 %1425 }
 0xdba   : > { %v1427_v27 = vsub.f32 %v1423_v24, %v1426_v26 }
 0xdbc   : > { %v1428_v28 = vmul.f32 1.442695, %v1427_v27 }
 0xdbd   : > { %v1437_v29 = vpop.permute.xlu1 %1436 }
 0xdbe   : > { %2716 = vpow2.f32 %v1428_v28  ;;  %2471 = vmatpush3.msra.mxu0 %v1437_v29 }
 0xdbf   : > { %2475 = vmatprep.subr.mxu0 %v2796_v13 }
 0xdc1   : > { %v1515_v35 = vpop.permute.xlu1 %1514 }
 0xdc8   : > { %v2717_v30 = vpop.eup %2716 }
 0xdc9   : > { %v1430_v32 = vsel %vm571_vm4, %v2717_v30, 0.0 }
 0xdca   : > { %1431 = vadd.xlane.f32.xlu0 %v1430_v32 }
 0xde0   : > { %1516 = vrot.lane.b32.xlu0 %v1333_v15, %s3359_s12  ;;  %s318_s12 = sand.u32 1, %s2784_s28  }
 0xde1   : > { %s2095_s10 = scalar_lea.sflag [#allocation3], %s318_s12 }
 0xe57   : > { %v1432_v33 = vpop.xlane.xlu0 %1431 }
 0xe58   : > { %2718 = vrcp.f32 %v1432_v33  ;;  %v2246_v33 = vld [vmem:[%s3353_s7 + $0x14] ss:$0 sm:$0xff] }
 0xe5b   : > { %v1517_v34 = vpop.permute.xlu0 %1516 }
 0xe62   : > { %v2719_v8 = vpop.eup %2718 }
 0xe63   : > { %v1434_v11 = vmul.f32 %v2719_v8, %v2717_v30 }
 0xe65   : > { %2473 = vmatmul.mubr.msk.f32.vlgmr.msra.gmra.mrb[18].mxu0 %vm571_vm4, %v1434_v11  ;;  %v2247_v11 = vld [vmem:[%s3353_s7 + $0x15] ss:$0 sm:$0xff] }
 0xe66   : > { %2476 = vmatpush3.xpose.msk.msra.mxu0 %vm493_vm2, %v1517_v34  ;;  %2477 = vmatprep.mubr.msk.f32.mxu0 %vm2797_vm1, %v2796_v13 }
 0xe67   : > { %2480 = vmatprep.subr.mxu0 %v2796_v13 }
 0xe69   : > { %2478 = vmatmul.mubr.msk.f32.vlgmr.msra.gmra.mrb[20].mxu0 %vm493_vm2, %v1515_v35 }
 0xe6a   : > { %2482 = vmatprep.mubr.msk.f32.mxu0 %vm2797_vm1, %v2796_v13 }
 0xf38   : > { %v1508_v36 = vpop.f32.mrb[18].mxu0 }
 0xf39   : > { %v2474_v37 = vpop.f32.mrb[19].mxu0 }
 0xf3a   : > { %v2258_v37 = vld [vmem:[%s3352_s6 + $0x98] sm:$0xff] }
 0xf3c   : > { %v1588_v38 = vpop.f32.mrb[20].mxu0 }
 0xf3d   : > { %v1592_v39 = vmul.f32 0.25, %v1588_v38  ;;  %v2479_v40 = vpop.f32.mrb[21].mxu0 }
 0xf3e   : > { %v2260_v40 = vld [vmem:[%s3352_s6 + $0xa8] sm:$0xff] }
 0xf3f   : > { %v1593_v41 = vadd.f32 %v1592_v39, %v2977_v47  ;;  %v2259_v39 = vld [vmem:[%s3352_s6 + $0xa0] sm:$0xff] }
 0xf41   : > { %v1594_v42 = vsel %vm571_vm4, %v1593_v41, -inf }
 0xf42   : > { %1595 = vmax.xlane.f32.xlu1 %v1594_v42  ;;  %v2261_v42 = vld [vmem:[%s3352_s6 + $0xb0] sm:$0xff] }
 0xf53   : > { %1605 = vrot.lane.b32.xlu1 %v1343_v25, %s3360_s19  ;;  %s2192_s19 = sshll.u32 %s318_s12, 3 }
 0xf54   : > { %s320_s20 = scalar_lea.vmem [#allocation2], %s2192_s19  ;;  %s2734_s19 = sshll.u32 %s2804_s9, 4  ;;  %s2735_s19 = int_to_ptr.vmem [resolvable:$false] %s2734_s19 }
 0xf55   : > { %s2108_s21 = sshll.u32 %s320_s20, 4  ;;  %s2736_s26 = scalar_lea.vmem %s2735_s19, 256  ;;  %s3305_s21 = int_to_ptr.vmem [resolvable:$true] %s2108_s21 }
 0xf56   : > { %p2737_p0 = scmp.lt.s32.totalorder %s3305_s21, %s2735_s19 }
 0xf57   : > { %2695 = vrot.lane.b32.xlu1 %v2694_v43, %s2798_s23  ;;  %v2262_v43 = vld [vmem:[%s3352_s6 + $0xb8] sm:$0xff] }
 0xfcf   : > { %v1596_v44 = vpop.xlane.xlu1 %1595 }
 0xfd0   : > { %v1597_v45 = vsub.f32 %v1593_v41, %v1596_v44  ;;  %v2612_v41 = vpack.c.bf16 %v2260_v40, %v2259_v39  ;;  %v2615_v44 = vpack.c.bf16 %v2262_v43, %v2261_v42 }
 0xfd2   : > { %v1598_v46 = vmul.f32 1.442695, %v1597_v45  ;;  %v2263_v45 = vld [vmem:[%s3352_s6 + $0xc0] sm:$0xff] }
 0xfd3   : > { %v1606_v31 = vpop.permute.xlu1 %1605 }
 0xfd4   : > { %2720 = vpow2.f32 %v1598_v46  ;;  %2481 = vmatpush3.msra.mxu0 %v1606_v31  ;;  %v2264_v46 = vld [vmem:[%s3352_s6 + $0xc8] sm:$0xff] }
 0xfd5   : > { %2593 = vmatprep.subr.bf16.mxu0 %v2795_v9  ;;  %v2618_v31 = vpack.c.bf16 %v2264_v46, %v2263_v45 }
 0xfd7   : > { %v2696_v48 = vpop.permute.xlu1 %2695 }
 0xfd8   : > { %v2698_v47 = vunpack.i.h.bf16 %v2696_v48  ;;  %v2697_v51 = vunpack.i.l.bf16 %v2696_v48  ;;  %v2265_v48 = vld [vmem:[%s3352_s6 + $0xd0] sm:$0xff] }
 0xfda   : > { %v2597_v54 = vpack.c.bf16 %v2698_v47, %v2697_v51  ;;  %v2266_v47 = vld [vmem:[%s3352_s6 + $0xd8] sm:$0xff] }
 0xfdb   : > { %v2621_v51 = vpack.c.bf16 %v2266_v47, %v2265_v48 }
 0xfdc   : > { %2598 = vmatpush3.bf16.msra.mxu1 %v2597_v54  ;;  %v2267_v54 = vld [vmem:[%s3352_s6 + $0xe0] sm:$0xff] }
 0xfdd   : > { %2605 = vmatprep.subr.bf16.mxu1 %v2795_v9 }
 0xfde   : > { %v2721_v55 = vpop.eup %2720 }
 0xfdf   : > { %2497 = vmatmul.mubr.msk.f32.vlgmr.msra.gmra.mrb[4].mxu1 %vm493_vm2, %v1508_v36  ;;  %v1600_v49 = vsel %vm571_vm4, %v2721_v55, 0.0  ;;  %v2257_v36 = vld [vmem:[%s3352_s6 + $0x90] sm:$0xff] }
 0xfe0   : > { %1601 = vadd.xlane.f32.xlu0 %v1600_v49  ;;  %2542 = vmatprep.mubr.msk.f32.mxu1 %vm2797_vm1, %v2796_v13  ;;  %v2609_v38 = vpack.c.bf16 %v2258_v37, %v2257_v36 }
 0xfe1   : > { %2607 = vmatpush3.bf16.msra.mxu1 %v2606_v23 }
 0xfe2   : > { %2608 = vmatprep.subr.bf16.mxu1 %v2795_v9 }
 0xfe5   : > { %2610 = vmatpush3.bf16.msra.mxu1 %v2609_v38 }
 0xfe6   : > { %2611 = vmatprep.subr.bf16.mxu1 %v2795_v9 }
 0xfe9   : > { %2613 = vmatpush3.bf16.msra.mxu1 %v2612_v41 }
 0xfea   : > { %2614 = vmatprep.subr.bf16.mxu1 %v2795_v9 }
 0xfed   : > { %2616 = vmatpush3.bf16.msra.mxu1 %v2615_v44 }
 0xfee   : > { %2617 = vmatprep.subr.bf16.mxu1 %v2795_v9 }
 0xff1   : > { %2619 = vmatpush3.bf16.msra.mxu1 %v2618_v31 }
 0xff2   : > { %2620 = vmatprep.subr.bf16.mxu1 %v2795_v9 }
 0xff5   : > { %2622 = vmatpush3.bf16.msra.mxu1 %v2621_v51 }
 0xff6   : > { %2690 = vrot.lane.b32.xlu0 %v2689_v50, %s2798_s23  ;;  %2623 = vmatprep.subr.bf16.mxu1 %v2795_v9  ;;  %v2269_v50 = vld [vmem:[%s3352_s6 + $0xf0] sm:$0xff]  ;;  %s2730_s23 = scalar_lea.vmem %s3305_s21, 128 }
 0xff7   : > { %p2731_p11 = scmp.ne.s32.totalorder %s3305_s21, %s2730_s23  ;;  %p2738_p1 = scmp.lt.s32.totalorder %s2736_s26, %s2730_s23 }
 0xff9   : > { %p2732_p12 = pnand %p2731_p11, %p2888_p5  ;;  %p2739_p2 = por %p2738_p1, %p2737_p0 }
 0xffb   : > { %p2733_p13 = pneg %p2732_p12 }
 0xffd   : > { %p2740_p3 = pnand %p2739_p2, %p2733_p13 }
0x106d   : > { %v1602_v56 = vpop.xlane.xlu0 %1601 }
0x106e   : > { %2722 = vrcp.f32 %v1602_v56  ;;  %v2270_v56 = vld [vmem:[%s3352_s6 + $0xf8] sm:$0xff] }
0x1071   : > { %v2691_v59 = vpop.permute.xlu0 %2690 }
0x1072   : > { %v2693_v60 = vunpack.i.h.bf16 %v2691_v59  ;;  %v2692_v61 = vunpack.i.l.bf16 %v2691_v59 }
0x1074   : > { %v2594_v62 = vpack.c.bf16 %v2693_v60, %v2692_v61 }
0x1078   : > { %v2723_v57 = vpop.eup %2722 }
0x1079   : > { %v1604_v58 = vmul.f32 %v2723_v57, %v2721_v55  ;;  %v2268_v55 = vld [vmem:[%s3352_s6 + $0xe8] sm:$0xff]  ;;  %v2627_v57 = vpack.c.bf16 %v2270_v56, %v2269_v50 }
0x107a   : > { %v2624_v49 = vpack.c.bf16 %v2268_v55, %v2267_v54 }
0x107b   : > { %2483 = vmatmul.mubr.msk.f32.vlgmr.msra.gmra.mrb[22].mxu0 %vm571_vm4, %v1604_v58  ;;  %v2253_v58 = vld [vmem:[%s3351_s5 + $0x48] ss:$0 sm:$0xff] }
0x107c   : > { %2489 = vmatprep.mubr.msk.f32.mxu0 %vm2797_vm1, %v2796_v13  ;;  %2595 = vmatpush3.bf16.msra.mxu0 %v2594_v62 }
0x107d   : > { %2599 = vmatprep.subr.bf16.mxu0 %v2795_v9  ;;  %2625 = vmatpush3.bf16.msra.mxu1 %v2624_v49 }
0x107e   : > { %2626 = vmatprep.subr.bf16.mxu1 %v2795_v9 }
0x1081   : > { %2628 = vmatpush3.bf16.msra.mxu1 %v2627_v57 }
0x10b2   : > { %v1841_v63 = vpop.f32.mrb[4].mxu1 }
0x10b3   : > { %v2498_v52 = vpop.f32.mrb[5].mxu1 }
0x114e   : > { %v1677_v53 = vpop.f32.mrb[22].mxu0 }
0x114f   : > { %v2484_v0 = vpop.f32.mrb[23].mxu0  ;;  %2490 = vmatmul.mubr.msk.f32.vlgmr.msra.gmra.mrb[24].mxu0 %vm493_vm2, %v1677_v53 }
0x1150   : > { %2507 = vmatprep.mubr.msk.f32.mxu0 %vm2797_vm1, %v2796_v13  ;;  %v2248_v13 = vld [vmem:[%s3351_s5 + $0x28] sm:$0xff] }
0x1151   : > { %v2600_v18 = vpack.c.bf16 %v2249_v17, %v2248_v13 }
0x1153   : > { %2601 = vmatpush3.bf16.msra.mxu0 %v2600_v18 }
0x1154   : > { %2602 = vmatprep.subr.bf16.mxu0 %v2795_v9  ;;  %v2272_v9 = vld [vmem:[%s3353_s7 + $0x16] ss:$0 sm:$0xff] }
0x1222   : > { %v1760_v1 = vpop.f32.mrb[24].mxu0 }
0x1223   : > { %v1842_v3 = vadd.f32 %v1841_v63, %v1760_v1  ;;  %v2491_v4 = vpop.f32.mrb[25].mxu0 }
0x1225   : > { %v1850_v5 = vadd.f32 %v2243_v2, %v1842_v3 }
0x1227   : > { %v1851_v12 = vadd.f32 %v1850_v5, %v3147_v10  ;;  %v2250_v10 = vld [vmem:[%s3351_s5 + $0x38] sm:$0xff] }
0x1228   : > { %v2603_v20 = vpack.c.bf16 %v2251_v19, %v2250_v10 }
0x1229   : > { %v1854_v14 = vsel %vm352_vm0, %v1851_v12, 0.0  ;;  %v1858_v15 = vmul.f32 %v1851_v12, %v1851_v12 }
0x122a   : > { %1855 = vadd.xlane.f32.xlu1 %v1854_v14  ;;  %2604 = vmatpush3.bf16.msra.mxu0 %v2603_v20 }
0x122b   : > { %v1859_v16 = vsel %vm352_vm0, %v1858_v15, 0.0 }
0x122c   : > { %1860 = vadd.xlane.f32.xlu0 %v1859_v16 }
0x12b7   : > { %v1856_v24 = vpop.xlane.xlu1 %1855 }
0x12b8   : > { %v1857_v6 = vmul.f32 0.03125, %v1856_v24 }
0x12b9   : > { %v1861_v7 = vpop.xlane.xlu0 %1860 }
0x12ba   : > { %v1863_v25 = vmul.f32 %v1857_v6, %v1857_v6  ;;  %v1862_v26 = vmul.f32 0.03125, %v1861_v7  ;;  %v1866_v30 = vsub.f32 %v1851_v12, %v1857_v6 }
0x12bc   : > { %v1864_v27 = vsub.f32 %v1862_v26, %v1863_v25  ;;  %v2275_v25 = vld [vmem:[%s3353_s7 + $0x17] ss:$0 sm:$0xff] }
0x12be   : > { %v1865_v28 = vmax.f32 %v1864_v27, 0.0  ;;  %v2276_v27 = vld [vmem:[%s3353_s7 + $0x18] ss:$0 sm:$0xff] }
0x12c0   : > { %v1867_v29 = vadd.f32 1e-12, %v1865_v28 }
0x12c2   : > { %2724 = vrsqrt.f32 %v1867_v29 }
0x12cc   : > { %v2725_v32 = vpop.eup %2724 }
0x12cd   : > { %v1869_v8 = vmul.f32 %v2725_v32, %v1866_v30 }
0x12cf   : > { %v1874_v34 = vmul.f32 %v2246_v33, %v1869_v8 }
0x12d1   : > { %v1879_v35 = vadd.f32 %v2247_v11, %v1874_v34 }
0x12d3   : > { %2508 = vmatmul.mubr.msk.f32.vlgmr.msra.gmra.mrb[26].mxu0 %vm352_vm0, %v1879_v35 }
0x13a6   : > { %v1959_v59 = vpop.f32.mrb[26].mxu0 }
0x13a7   : > { %v1960_v60 = vadd.f32 %v2253_v58, %v1959_v59  ;;  %v2509_v61 = vpop.f32.mrb[27].mxu0 }
0x13a9   : > { %v1964_v62 = vmul.f32 0.044715, %v1960_v60  ;;  %v1963_v2 = vmul.f32 0.5, %v1960_v60 }
0x13ab   : > { %v1965_v63 = vmul.f32 %v1964_v62, %v1960_v60 }
0x13ad   : > { %v1966_v52 = vmul.f32 %v1965_v63, %v1960_v60 }
0x13af   : > { %v1967_v53 = vadd.f32 %v1966_v52, %v1960_v60 }
0x13b1   : > { %v1968_v0 = vmul.f32 0.7978846, %v1967_v53 }
0x13b3   : > { %2726 = vtanh.f32 %v1968_v0 }
0x13bd   : > { %v2727_v1 = vpop.eup %2726 }
0x13be   : > { %v1970_v3 = vadd.f32 1.0, %v2727_v1 }
0x13c0   : > { %v1971_v4 = vmul.f32 %v1970_v3, %v1963_v2 }
0x13c2   : > { %2543 = vmatmul.mubr.f32.vlgmr.msra.gmra.mrb[6].mxu1 %v1971_v4 }
0x1495   : > { %v2060_v5 = vpop.f32.mrb[6].mxu1 }
0x1496   : > { %v2061_v12 = vadd.f32 %v2272_v9, %v2060_v5  ;;  %v2544_v14 = vpop.f32.mrb[7].mxu1 }
0x1498   : > { %v2064_v15 = vadd.f32 %v2061_v12, %v1879_v35 }
0x149a   : > { %v2067_v16 = vsel %vm352_vm0, %v2064_v15, 0.0  ;;  %v2071_v13 = vmul.f32 %v2064_v15, %v2064_v15 }
0x149b   : > { %2068 = vadd.xlane.f32.xlu1 %v2067_v16 }
0x149c   : > { %v2072_v17 = vsel %vm352_vm0, %v2071_v13, 0.0 }
0x149d   : > { %2073 = vadd.xlane.f32.xlu0 %v2072_v17 }
0x1528   : > { %v2069_v18 = vpop.xlane.xlu1 %2068 }
0x1529   : > { %v2070_v10 = vmul.f32 0.03125, %v2069_v18 }
0x152a   : > { %v2074_v19 = vpop.xlane.xlu0 %2073 }
0x152b   : > { %v2076_v20 = vmul.f32 %v2070_v10, %v2070_v10  ;;  %v2075_v21 = vmul.f32 0.03125, %v2074_v19  ;;  %v2079_v6 = vsub.f32 %v2064_v15, %v2070_v10 }
0x152d   : > { %v2077_v22 = vsub.f32 %v2075_v21, %v2076_v20 }
0x152f   : > { %v2078_v23 = vmax.f32 %v2077_v22, 0.0 }
0x1531   : > { %v2080_v24 = vadd.f32 1e-12, %v2078_v23 }
0x1533   : > { %2728 = vrsqrt.f32 %v2080_v24 }
0x153d   : > { %v2729_v7 = vpop.eup %2728 }
0x153e   : > { %v2082_v26 = vmul.f32 %v2729_v7, %v2079_v6 }
0x1540   : > { %v2087_v28 = vmul.f32 %v2275_v25, %v2082_v26 }
0x1542   : > { %v2092_v29 = vadd.f32 %v2276_v27, %v2087_v28 }
0x1544   : > { %2093 = vst.msk [vmem:[%s320_s20] sm:$0xff] %vm352_vm0, %v2092_v29 }
0x1545   : > { %2743 = shalt.err (!%p2740_p3)
}
0x1546   : > { %s2744_s12 = scalar_lea.hbm %s3303_s24, 128  ;;  %s2748_s18 = scalar_lea.hbm %s3354_s8, 256 }
0x1547   : > { %p2745_p4 = scmp.ne.s32.totalorder %s3303_s24, %s2744_s12  ;;  %p2749_p9 = scmp.lt.u32.totalorder %s3303_s24, %s3354_s8 }
0x1548   : > { %p2750_p10 = scmp.lt.u32.totalorder %s2748_s18, %s2744_s12  ;;  %p2752_p12 = scmp.lt.u32.totalorder %s2744_s12, %s3303_s24 }
0x1549   : > { %p2746_p7 = pnand %p2745_p4, %p2888_p5 }
0x154a   : > { %p2751_p11 = por %p2750_p10, %p2749_p9 }
0x154b   : > { %p2747_p8 = pneg %p2746_p7 }
0x154c   : > { %p2753_p13 = por %p2752_p12, %p2751_p11 }
0x154e   : > { %p2754_p0 = pnand %p2753_p13, %p2747_p8 }
0x1550   : > { %2757 = shalt.err (!%p2754_p0)
}
0x1551   : > { %2629 = dma.vmem_to_hbm [thread:$0]  (%p2888_p5), %s3305_s21, 128, %s3303_s24, %s2095_s10  }
0x1552 PF: > { %p2635_p1 = scmp.ge.s32.totalorder %s2792_s30, 2  ;;  %s2120_s17 = sand.u32 1, %s2780_s27  }
0x1553   : > { %s2121_s23 = scalar_lea.sflag [#allocation3], %s2120_s17 }
0x1554   : > { %p2632_p2 = pnand %p2635_p1, %p2892_p6 }
0x1556   : > { %2775 = dma.done.wait (!%p2632_p2), %s2121_s23, 128  }
0x1557   : > { %2777 = vsyncadd (!%p2632_p2), %s2121_s23, 4294967168  ;;  %p18_p3 = scmp.ge.s32.totalorder %s2875_s11, 4   ;;  %s3361_s27 = smov %s2784_s28 }
0x1558   : > { %s3362_s28 = smov %s2788_s29  ;;  %s3363_s29 = smov %s2886_s14 }
0x1559   : > { %s3364_s30 = smov %s2875_s11  ;;  %20 = sbr.rel (!%p18_p3) target bundleno = 3 (0x3), region = 97 }
0x1560   :  { %2126 = vsyncpa [#allocation3], 1 }
0x1561   :  { %2128 = vsyncpa [#allocation3 + $0x1], 1 }

</bundles_post_ra>
